<compile_context>
chip_gen: v7x
topology: tpu7x:2x2x1
jax: 0.10.0
libtpu: 0.0.40
codegen_flags: <defaults>
</compile_context>

<pallas_src>
import jax
import jax.numpy as jnp
from jax.experimental import pallas as pl
from jax.experimental.pallas import tpu as pltpu  # noqa: F401  (TPU backend)

MXU_DTYPE = jnp.bfloat16   # MXU operand dtype; epilogue/accum stay f32
BN_EPS = 1e-5              # torch.nn.BatchNorm2d default
CONV_CHANNELS = [1, 28, 64, 128]


# ----------------------------- Pallas kernel -------------------------------

def _conv_relu_bn_kernel(p_ref, w_ref, b_ref, g_ref, bt_ref, o_ref):
    """One fused encoder layer on a single VMEM tile.

    out = BatchNorm(ReLU(W @ patches + b)), where the batch statistics are
    reduced over the lane axis M = B*Ho*Wo -- exactly BatchNorm2d train mode.
    Output layout is lane-dense [Cout, M].
    """
    acc = jnp.dot(w_ref[...], p_ref[...],
                  preferred_element_type=jnp.float32)          # [Cout, M] f32
    acc = acc + b_ref[...]                                     # bias
    acc = jnp.maximum(acc, 0.0)                                # ReLU
    mean = jnp.mean(acc, axis=1, keepdims=True)                # per-channel
    var = jnp.mean(jnp.square(acc - mean), axis=1, keepdims=True)  # biased
    inv = jax.lax.rsqrt(var + BN_EPS)
    o_ref[...] = (acc - mean) * inv * g_ref[...] + bt_ref[...]


# --------------------------- conv lowering (glue) ---------------------------

def _make_patches(x_cbhw, kh, kw, stride, pad):
    """x:[Cin,B,H,W] (C-major) -> patches [Cin*kh*kw, B*Ho*Wo] in bf16.

    K ordering is (ci, i, j), matching w.reshape(Cout, Cin*kh*kw). No
    transposes are needed because the activation is already channel-major.
    """
    C, B, H, W = x_cbhw.shape
    xp = jnp.pad(x_cbhw.astype(MXU_DTYPE),
                 ((0, 0), (0, 0), (pad, pad), (pad, pad)))
    Ho = (H + 2 * pad - kh) // stride + 1
    Wo = (W + 2 * pad - kw) // stride + 1
    taps = []
    for i in range(kh):
        for j in range(kw):
            taps.append(xp[:, :,
                           i:i + stride * (Ho - 1) + 1:stride,
                           j:j + stride * (Wo - 1) + 1:stride])  # [C,B,Ho,Wo]
    pat = jnp.stack(taps, axis=1)                 # [C, kh*kw, B, Ho, Wo]
    return pat.reshape(C * kh * kw, B * Ho * Wo), Ho, Wo


def conv_relu_bn(x_cbhw, w_mat, b, g, bt, *, kh=3, kw=3, stride=2, pad=1):
    """Fused Conv2d(k=3,s=2,p=1) + ReLU + BatchNorm2d (batch stats).

    x: [Cin, B, H, W]  (channel-major activation layout)
    w_mat: [Cout, Cin*kh*kw] bf16;  b/g/bt: [Cout, 1] f32.
    Returns [Cout, B, Ho, Wo] f32.
    """
    _, B, _, _ = x_cbhw.shape
    Cout = w_mat.shape[0]
    patches, Ho, Wo = _make_patches(x_cbhw, kh, kw, stride, pad)
    out = pl.pallas_call(
        _conv_relu_bn_kernel,
        out_shape=jax.ShapeDtypeStruct((Cout, B * Ho * Wo), jnp.float32),
    )(patches, w_mat, b, g, bt)
    return out.reshape(Cout, B, Ho, Wo)


# ------------------------------- parameters --------------------------------

def init_params(key):
    """Parameters are pre-processed once (hoisted out of the forward pass):
    weights pre-flattened to the [Cout, K] matmul layout and pre-cast to bf16,
    bias/gamma/beta pre-reshaped to the [C, 1] broadcast shape."""
    layers = []
    ks = jax.random.split(key, len(CONV_CHANNELS) - 1)
    for idx, (cin, cout) in enumerate(zip(CONV_CHANNELS[:-1],
                                          CONV_CHANNELS[1:])):
        fan_in = cin * 9
        w = (jax.random.normal(ks[idx], (cout, cin, 3, 3), jnp.float32)
             / jnp.sqrt(float(fan_in)))
        layers.append((
            w.reshape(cout, fan_in).astype(MXU_DTYPE),   # [Cout, K] bf16
            jnp.zeros((cout, 1), jnp.float32),           # conv bias
            jnp.ones((cout, 1), jnp.float32),            # BN gamma
            jnp.zeros((cout, 1), jnp.float32),           # BN beta
        ))
    return {"layers": tuple(layers)}


# -------------------------------- forward ----------------------------------

def encoder_forward(params, x_nchw):
    """Matches Encoder.forward: 3 x (Conv->ReLU->BN) then Flatten."""
    B = x_nchw.shape[0]
    h = x_nchw.transpose(1, 0, 2, 3)          # -> [C, B, H, W] channel-major
    for (w_mat, b, g, bt) in params["layers"]:
        h = conv_relu_bn(h, w_mat, b, g, bt)  # one fused pallas_call / layer
    C, _, Hf, Wf = h.shape
    # torch.nn.Flatten over (C, H, W) per batch element.
    return h.transpose(1, 0, 2, 3).reshape(B, C * Hf * Wf)


# ---------------------------------- main ------------------------------------

if __name__ == "__main__":
    key = jax.random.PRNGKey(0)
    k_params, k_x = jax.random.split(key)

    params = init_params(k_params)
    # MNIST-like input: 28x28 -> 14 -> 7 -> 4 spatial; flatten = 128*4*4 = 2048.
    x = jax.random.normal(k_x, (2, 1, 28, 28), jnp.float32)

    fwd = jax.jit(encoder_forward)
    out = fwd(params, x)
    jax.block_until_ready(out)

    assert out.shape == (2, 2048), out.shape
    assert bool(jnp.all(jnp.isfinite(out))), "non-finite output"
    print("KERNEL_OK")
</pallas_src>

<mosaic_0001>
module attributes {stable_mosaic.version = 11 : i64} {
  func.func @_conv_relu_bn_kernel(%arg0: memref<9x392xbf16, #tpu.memory_space<vmem>>, %arg1: memref<28x9xbf16, #tpu.memory_space<vmem>>, %arg2: memref<28x1xf32, #tpu.memory_space<vmem>>, %arg3: memref<28x1xf32, #tpu.memory_space<vmem>>, %arg4: memref<28x1xf32, #tpu.memory_space<vmem>>, %arg5: memref<28x392xf32, #tpu.memory_space<vmem>>) attributes {dimension_semantics = [], scalar_prefetch = 0 : i64, scratch_operands = 0 : i64, tpu.core_type = #tpu.core_type<tc>} {
    %c0 = arith.constant 0 : index
    %c0_0 = arith.constant 0 : index
    %0 = vector.load %arg1[%c0, %c0_0] : memref<28x9xbf16, #tpu.memory_space<vmem>>, vector<28x9xbf16>
    %c0_1 = arith.constant 0 : index
    %c0_2 = arith.constant 0 : index
    %1 = vector.load %arg0[%c0_1, %c0_2] : memref<9x392xbf16, #tpu.memory_space<vmem>>, vector<9x392xbf16>
    %cst = arith.constant dense<0.000000e+00> : vector<28x392xf32>
    %2 = tpu.matmul %0, %1, %cst {dimension_numbers = #tpu.dot_dimension_numbers<[1], [0], [0], [1], [0, 0, 1, 1], [], []>} : vector<28x9xbf16>, vector<9x392xbf16>, vector<28x392xf32> -> vector<28x392xf32>
    %c0_3 = arith.constant 0 : index
    %c0_4 = arith.constant 0 : index
    %3 = vector.load %arg2[%c0_3, %c0_4] : memref<28x1xf32, #tpu.memory_space<vmem>>, vector<28x1xf32>
    %4 = vector.broadcast %3 : vector<28x1xf32> to vector<28x392xf32>
    %5 = arith.addf %2, %4 : vector<28x392xf32>
    %cst_5 = arith.constant 0.000000e+00 : f32
    %6 = vector.broadcast %cst_5 : f32 to vector<28x392xf32>
    %7 = arith.maximumf %5, %6 : vector<28x392xf32>
    %cst_6 = arith.constant dense<0.000000e+00> : vector<28xf32>
    %8 = vector.multi_reduction <add>, %7, %cst_6 [1] : vector<28x392xf32> to vector<28xf32>
    %9 = vector.shape_cast %8 : vector<28xf32> to vector<28x1xf32>
    %cst_7 = arith.constant 3.920000e+02 : f32
    %10 = vector.broadcast %cst_7 : f32 to vector<28x1xf32>
    %11 = arith.divf %9, %10 : vector<28x1xf32>
    %12 = vector.broadcast %11 : vector<28x1xf32> to vector<28x392xf32>
    %13 = arith.subf %7, %12 : vector<28x392xf32>
    %14 = arith.mulf %13, %13 : vector<28x392xf32>
    %cst_8 = arith.constant dense<0.000000e+00> : vector<28xf32>
    %15 = vector.multi_reduction <add>, %14, %cst_8 [1] : vector<28x392xf32> to vector<28xf32>
    %16 = vector.shape_cast %15 : vector<28xf32> to vector<28x1xf32>
    %cst_9 = arith.constant 3.920000e+02 : f32
    %17 = vector.broadcast %cst_9 : f32 to vector<28x1xf32>
    %18 = arith.divf %16, %17 : vector<28x1xf32>
    %cst_10 = arith.constant 9.99999974E-6 : f32
    %19 = vector.broadcast %cst_10 : f32 to vector<28x1xf32>
    %20 = arith.addf %18, %19 : vector<28x1xf32>
    %21 = math.rsqrt %20 : vector<28x1xf32>
    %22 = vector.broadcast %11 : vector<28x1xf32> to vector<28x392xf32>
    %23 = arith.subf %7, %22 : vector<28x392xf32>
    %24 = vector.broadcast %21 : vector<28x1xf32> to vector<28x392xf32>
    %25 = arith.mulf %23, %24 : vector<28x392xf32>
    %c0_11 = arith.constant 0 : index
    %c0_12 = arith.constant 0 : index
    %26 = vector.load %arg3[%c0_11, %c0_12] : memref<28x1xf32, #tpu.memory_space<vmem>>, vector<28x1xf32>
    %27 = vector.broadcast %26 : vector<28x1xf32> to vector<28x392xf32>
    %28 = arith.mulf %25, %27 : vector<28x392xf32>
    %c0_13 = arith.constant 0 : index
    %c0_14 = arith.constant 0 : index
    %29 = vector.load %arg4[%c0_13, %c0_14] : memref<28x1xf32, #tpu.memory_space<vmem>>, vector<28x1xf32>
    %30 = vector.broadcast %29 : vector<28x1xf32> to vector<28x392xf32>
    %31 = arith.addf %28, %30 : vector<28x392xf32>
    %c0_15 = arith.constant 0 : index
    %c0_16 = arith.constant 0 : index
    %32 = vector.load %arg5[%c0_15, %c0_16] : memref<28x392xf32, #tpu.memory_space<vmem>>, vector<28x392xf32>
    tpu.vector_store %arg5[%c0_15, %c0_16], %31 {strides = array<i32>} : memref<28x392xf32, #tpu.memory_space<vmem>>, vector<28x392xf32>,
    return
  }
}

module attributes {stable_mosaic.version = 11 : i64} {
  func.func @_conv_relu_bn_kernel(%arg0: memref<252x98xbf16, #tpu.memory_space<vmem>>, %arg1: memref<64x252xbf16, #tpu.memory_space<vmem>>, %arg2: memref<64x1xf32, #tpu.memory_space<vmem>>, %arg3: memref<64x1xf32, #tpu.memory_space<vmem>>, %arg4: memref<64x1xf32, #tpu.memory_space<vmem>>, %arg5: memref<64x98xf32, #tpu.memory_space<vmem>>) attributes {dimension_semantics = [], scalar_prefetch = 0 : i64, scratch_operands = 0 : i64, tpu.core_type = #tpu.core_type<tc>} {
    %c0 = arith.constant 0 : index
    %c0_0 = arith.constant 0 : index
    %0 = vector.load %arg1[%c0, %c0_0] : memref<64x252xbf16, #tpu.memory_space<vmem>>, vector<64x252xbf16>
    %c0_1 = arith.constant 0 : index
    %c0_2 = arith.constant 0 : index
    %1 = vector.load %arg0[%c0_1, %c0_2] : memref<252x98xbf16, #tpu.memory_space<vmem>>, vector<252x98xbf16>
    %cst = arith.constant dense<0.000000e+00> : vector<64x98xf32>
    %2 = tpu.matmul %0, %1, %cst {dimension_numbers = #tpu.dot_dimension_numbers<[1], [0], [0], [1], [0, 0, 1, 1], [], []>} : vector<64x252xbf16>, vector<252x98xbf16>, vector<64x98xf32> -> vector<64x98xf32>
    %c0_3 = arith.constant 0 : index
    %c0_4 = arith.constant 0 : index
    %3 = vector.load %arg2[%c0_3, %c0_4] : memref<64x1xf32, #tpu.memory_space<vmem>>, vector<64x1xf32>
    %4 = vector.broadcast %3 : vector<64x1xf32> to vector<64x98xf32>
    %5 = arith.addf %2, %4 : vector<64x98xf32>
    %cst_5 = arith.constant 0.000000e+00 : f32
    %6 = vector.broadcast %cst_5 : f32 to vector<64x98xf32>
    %7 = arith.maximumf %5, %6 : vector<64x98xf32>
    %cst_6 = arith.constant dense<0.000000e+00> : vector<64xf32>
    %8 = vector.multi_reduction <add>, %7, %cst_6 [1] : vector<64x98xf32> to vector<64xf32>
    %9 = vector.shape_cast %8 : vector<64xf32> to vector<64x1xf32>
    %cst_7 = arith.constant 9.800000e+01 : f32
    %10 = vector.broadcast %cst_7 : f32 to vector<64x1xf32>
    %11 = arith.divf %9, %10 : vector<64x1xf32>
    %12 = vector.broadcast %11 : vector<64x1xf32> to vector<64x98xf32>
    %13 = arith.subf %7, %12 : vector<64x98xf32>
    %14 = arith.mulf %13, %13 : vector<64x98xf32>
    %cst_8 = arith.constant dense<0.000000e+00> : vector<64xf32>
    %15 = vector.multi_reduction <add>, %14, %cst_8 [1] : vector<64x98xf32> to vector<64xf32>
    %16 = vector.shape_cast %15 : vector<64xf32> to vector<64x1xf32>
    %cst_9 = arith.constant 9.800000e+01 : f32
    %17 = vector.broadcast %cst_9 : f32 to vector<64x1xf32>
    %18 = arith.divf %16, %17 : vector<64x1xf32>
    %cst_10 = arith.constant 9.99999974E-6 : f32
    %19 = vector.broadcast %cst_10 : f32 to vector<64x1xf32>
    %20 = arith.addf %18, %19 : vector<64x1xf32>
    %21 = math.rsqrt %20 : vector<64x1xf32>
    %22 = vector.broadcast %11 : vector<64x1xf32> to vector<64x98xf32>
    %23 = arith.subf %7, %22 : vector<64x98xf32>
    %24 = vector.broadcast %21 : vector<64x1xf32> to vector<64x98xf32>
    %25 = arith.mulf %23, %24 : vector<64x98xf32>
    %c0_11 = arith.constant 0 : index
    %c0_12 = arith.constant 0 : index
    %26 = vector.load %arg3[%c0_11, %c0_12] : memref<64x1xf32, #tpu.memory_space<vmem>>, vector<64x1xf32>
    %27 = vector.broadcast %26 : vector<64x1xf32> to vector<64x98xf32>
    %28 = arith.mulf %25, %27 : vector<64x98xf32>
    %c0_13 = arith.constant 0 : index
    %c0_14 = arith.constant 0 : index
    %29 = vector.load %arg4[%c0_13, %c0_14] : memref<64x1xf32, #tpu.memory_space<vmem>>, vector<64x1xf32>
    %30 = vector.broadcast %29 : vector<64x1xf32> to vector<64x98xf32>
    %31 = arith.addf %28, %30 : vector<64x98xf32>
    %c0_15 = arith.constant 0 : index
    %c0_16 = arith.constant 0 : index
    %32 = vector.load %arg5[%c0_15, %c0_16] : memref<64x98xf32, #tpu.memory_space<vmem>>, vector<64x98xf32>
    tpu.vector_store %arg5[%c0_15, %c0_16], %31 {strides = array<i32>} : memref<64x98xf32, #tpu.memory_space<vmem>>, vector<64x98xf32>,
    return
  }
}

module attributes {stable_mosaic.version = 11 : i64} {
  func.func @_conv_relu_bn_kernel(%arg0: memref<576x32xbf16, #tpu.memory_space<vmem>>, %arg1: memref<128x576xbf16, #tpu.memory_space<vmem>>, %arg2: memref<128x1xf32, #tpu.memory_space<vmem>>, %arg3: memref<128x1xf32, #tpu.memory_space<vmem>>, %arg4: memref<128x1xf32, #tpu.memory_space<vmem>>, %arg5: memref<128x32xf32, #tpu.memory_space<vmem>>) attributes {dimension_semantics = [], scalar_prefetch = 0 : i64, scratch_operands = 0 : i64, tpu.core_type = #tpu.core_type<tc>} {
    %c0 = arith.constant 0 : index
    %c0_0 = arith.constant 0 : index
    %0 = vector.load %arg1[%c0, %c0_0] : memref<128x576xbf16, #tpu.memory_space<vmem>>, vector<128x576xbf16>
    %c0_1 = arith.constant 0 : index
    %c0_2 = arith.constant 0 : index
    %1 = vector.load %arg0[%c0_1, %c0_2] : memref<576x32xbf16, #tpu.memory_space<vmem>>, vector<576x32xbf16>
    %cst = arith.constant dense<0.000000e+00> : vector<128x32xf32>
    %2 = tpu.matmul %0, %1, %cst {dimension_numbers = #tpu.dot_dimension_numbers<[1], [0], [0], [1], [0, 0, 1, 1], [], []>} : vector<128x576xbf16>, vector<576x32xbf16>, vector<128x32xf32> -> vector<128x32xf32>
    %c0_3 = arith.constant 0 : index
    %c0_4 = arith.constant 0 : index
    %3 = vector.load %arg2[%c0_3, %c0_4] : memref<128x1xf32, #tpu.memory_space<vmem>>, vector<128x1xf32>
    %4 = vector.broadcast %3 : vector<128x1xf32> to vector<128x32xf32>
    %5 = arith.addf %2, %4 : vector<128x32xf32>
    %cst_5 = arith.constant 0.000000e+00 : f32
    %6 = vector.broadcast %cst_5 : f32 to vector<128x32xf32>
    %7 = arith.maximumf %5, %6 : vector<128x32xf32>
    %cst_6 = arith.constant dense<0.000000e+00> : vector<128xf32>
    %8 = vector.multi_reduction <add>, %7, %cst_6 [1] : vector<128x32xf32> to vector<128xf32>
    %9 = vector.shape_cast %8 : vector<128xf32> to vector<128x1xf32>
    %cst_7 = arith.constant 3.200000e+01 : f32
    %10 = vector.broadcast %cst_7 : f32 to vector<128x1xf32>
    %11 = arith.divf %9, %10 : vector<128x1xf32>
    %12 = vector.broadcast %11 : vector<128x1xf32> to vector<128x32xf32>
    %13 = arith.subf %7, %12 : vector<128x32xf32>
    %14 = arith.mulf %13, %13 : vector<128x32xf32>
    %cst_8 = arith.constant dense<0.000000e+00> : vector<128xf32>
    %15 = vector.multi_reduction <add>, %14, %cst_8 [1] : vector<128x32xf32> to vector<128xf32>
    %16 = vector.shape_cast %15 : vector<128xf32> to vector<128x1xf32>
    %cst_9 = arith.constant 3.200000e+01 : f32
    %17 = vector.broadcast %cst_9 : f32 to vector<128x1xf32>
    %18 = arith.divf %16, %17 : vector<128x1xf32>
    %cst_10 = arith.constant 9.99999974E-6 : f32
    %19 = vector.broadcast %cst_10 : f32 to vector<128x1xf32>
    %20 = arith.addf %18, %19 : vector<128x1xf32>
    %21 = math.rsqrt %20 : vector<128x1xf32>
    %22 = vector.broadcast %11 : vector<128x1xf32> to vector<128x32xf32>
    %23 = arith.subf %7, %22 : vector<128x32xf32>
    %24 = vector.broadcast %21 : vector<128x1xf32> to vector<128x32xf32>
    %25 = arith.mulf %23, %24 : vector<128x32xf32>
    %c0_11 = arith.constant 0 : index
    %c0_12 = arith.constant 0 : index
    %26 = vector.load %arg3[%c0_11, %c0_12] : memref<128x1xf32, #tpu.memory_space<vmem>>, vector<128x1xf32>
    %27 = vector.broadcast %26 : vector<128x1xf32> to vector<128x32xf32>
    %28 = arith.mulf %25, %27 : vector<128x32xf32>
    %c0_13 = arith.constant 0 : index
    %c0_14 = arith.constant 0 : index
    %29 = vector.load %arg4[%c0_13, %c0_14] : memref<128x1xf32, #tpu.memory_space<vmem>>, vector<128x1xf32>
    %30 = vector.broadcast %29 : vector<128x1xf32> to vector<128x32xf32>
    %31 = arith.addf %28, %30 : vector<128x32xf32>
    %c0_15 = arith.constant 0 : index
    %c0_16 = arith.constant 0 : index
    %32 = vector.load %arg5[%c0_15, %c0_16] : memref<128x32xf32, #tpu.memory_space<vmem>>, vector<128x32xf32>
    tpu.vector_store %arg5[%c0_15, %c0_16], %31 {strides = array<i32>} : memref<128x32xf32, #tpu.memory_space<vmem>>, vector<128x32xf32>,
    return
  }
}

</mosaic_0001>

<bundles_post_ra>
// kernel: encoder_forward.3
= control target key start
LH: loop header
LB: loop body
LE: loop exit
PB: predicated region body
PF: predicated region fallthrough
CT: control target
= control target key end

     0   :  { %vm86_vm0 = vcmask 1043456   ;;  %vm87_vm1 = vcmask 1044480   ;;  %v475_v1 = vmov 0   ;;  %v476_v2 = vmov 65535   ;;  %s832_s0 = inlined_call_operand.vmem [shape: bf16[9,392], index: 0, kind: input, shape index: {}]   ;;  %s833_s1 = inlined_call_operand.vmem [shape: bf16[28,9], index: 1, kind: input, shape index: {}]   ;;  %s834_s2 = inlined_call_operand.vmem [shape: f32[28,1], index: 2, kind: input, shape index: {}]   ;;  %s835_s3 = inlined_call_operand.vmem [shape: f32[28,1], index: 3, kind: input, shape index: {}]   ;;  %s836_s4 = inlined_call_operand.vmem [shape: f32[28,1], index: 4, kind: input, shape index: {}]   ;;  %s837_s5 = inlined_call_operand.vmem [shape: f32[28,392], index: 5, kind: output, shape index: {}]  }
   0x1   :  { %v459_v0 = vld [vmem:[%s832_s0 + $0x4] ss:$16 sps:$4 sm:$0x1f]   ;;  %134 = vmatprep.mubr.bf16.mxu0 %v475_v1  ;;  %187 = vmatprep.mubr.bf16.mxu1 %v475_v1  ;;  %v88_v3 = vsel %vm86_vm0, 4294967295, %v476_v2  ;;  %v32_v12 = vld [vmem:[%s834_s2 + $0x18] sm:$0xf] }
   0x2   :  { %457 = vset.pattern.permute.xlu0 %v475_v1  ;;  %458 = vset.pattern.permute.xlu1 %v475_v1  ;;  %v89_v4 = vsel %vm87_vm1, %v88_v3, 0  ;;  %v461_v5 = vld [vmem:[%s832_s0 + $0xc] ss:$16 sps:$4 sm:$0x1f]   ;;  %v465_v13 = vld [vmem:[%s833_s1] sm:$0xff]   ;;  %vm79_vm2 = vcmask 72704  }
   0x3   :  { %v94_v6 = vand.u32 %v459_v0, %v89_v4  ;;  %v463_v7 = vld [vmem:[%s832_s0] ss:$16 sps:$4 sm:$0x1f]   ;;  %v464_v8 = vld [vmem:[%s832_s0 + $0x8] ss:$16 sps:$4 sm:$0x1f]   ;;  %v100_v9 = vand.u32 %v461_v5, %v89_v4  ;;  %50 = vperm.xlu0 %457, %v32_v12  }
   0x4   :  { %v91_v10 = vand.u32 %v463_v7, %v89_v4  ;;  %v97_v11 = vand.u32 %v464_v8, %v89_v4  ;;  %v30_v14 = vld [vmem:[%s834_s2 + $0x8] sm:$0xff]  ;;  %v29_v15 = vld [vmem:[%s834_s2] sm:$0xff]  ;;  %v31_v16 = vld [vmem:[%s834_s2 + $0x10] sm:$0xff]  ;;  %vm226_vm3 = vcmask 64512   ;;  %vm248_vm4 = vcmask 60416  }
   0x5   :  { %102 = vmatprep.subr.bf16.mxu0 %v94_v6  ;;  %155 = vmatprep.subr.bf16.mxu1 %v100_v9  ;;  %v466_v17 = vld [vmem:[%s833_s1 + $0x8] sm:$0x3f]  }
   0x6   :  { %103 = vmatpush1.bf16.msra.mxu0 %v91_v10  ;;  %156 = vmatpush1.bf16.msra.mxu1 %v97_v11 }
   0x7   :  { %40 = vperm.xlu1 %458, %v30_v14   ;;  %35 = vperm.xlu0 %457, %v29_v15  }
   0x9   :  { %451 = vmatmul.mubr.msk.bf16.vlgmr.msra.gmra.mrb[0].mxu0 %vm79_vm2, %v465_v13  ;;  %453 = vmatmul.mubr.msk.bf16.vlgmr.msra.gmra.mrb[0].mxu1 %vm79_vm2, %v465_v13 }
   0xa   :  { %144 = vmatprep.mubr.bf16.mxu0 %v475_v1  ;;  %197 = vmatprep.mubr.bf16.mxu1 %v475_v1 }
   0xb   :  { %45 = vperm.xlu1 %458, %v31_v16  }
  0x11   :  { %452 = vmatmul.mubr.msk.bf16.gmra.mrb[4].mxu0 %vm79_vm2, %v466_v17  ;;  %454 = vmatmul.mubr.msk.bf16.gmra.mrb[4].mxu1 %vm79_vm2, %v466_v17 }
  0x82   :  { %v51_v18 = vpop.permute.xlu0 %50 }
  0x86   :  { %v36_v19 = vpop.permute.xlu0 %35  ;;  %v41_v20 = vpop.permute.xlu1 %40 }
  0x8a   :  { %v46_v44 = vpop.permute.xlu1 %45 }
  0xdc   :  { %v136_v21 = vpop.f32.mrb[0].mxu0  ;;  %v189_v22 = vpop.f32.mrb[0].mxu1 }
  0xdd   :  { %v538_v23 = vadd.f32 %v136_v21, %v36_v19  ;;  %v540_v24 = vadd.f32 %v189_v22, %v36_v19  ;;  %v138_v25 = vpop.f32.mrb[1].mxu0  ;;  %v191_v26 = vpop.f32.mrb[1].mxu1 }
  0xde   :  { %v542_v27 = vadd.f32 %v138_v25, %v36_v19  ;;  %v544_v28 = vadd.f32 %v191_v26, %v36_v19  ;;  %v140_v29 = vpop.f32.mrb[2].mxu0  ;;  %v193_v30 = vpop.f32.mrb[2].mxu1 }
  0xdf   :  { %v208_v31 = vmax.f32 %v538_v23, 0.0  ;;  %v210_v32 = vmax.f32 %v540_v24, 0.0  ;;  %v548_v33 = vadd.f32 %v140_v29, %v41_v20  ;;  %v550_v34 = vadd.f32 %v193_v30, %v41_v20  ;;  %v142_v35 = vpop.f32.mrb[3].mxu0  ;;  %v195_v36 = vpop.f32.mrb[3].mxu1  ;;  %v345_v29 = vld [vmem:[%s835_s3] sm:$0xff]  ;;  %v347_v30 = vld [vmem:[%s835_s3 + $0x10] sm:$0xff] }
  0xe0   :  { %v209_v37 = vmax.f32 %v542_v27, 0.0  ;;  %v211_v38 = vmax.f32 %v544_v28, 0.0  ;;  %v554_v39 = vadd.f32 %v142_v35, %v41_v20  ;;  %v556_v40 = vadd.f32 %v195_v36, %v41_v20  ;;  %v348_v35 = vld [vmem:[%s835_s3 + $0x18] sm:$0xf]  ;;  %v386_v36 = vld [vmem:[%s836_s4 + $0x8] sm:$0xff] }
  0xe1   :  { %v212_v41 = vmax.f32 %v548_v33, 0.0  ;;  %v214_v46 = vmax.f32 %v550_v34, 0.0 }
  0xe2   :  { %v224_v42 = vadd.f32 %v209_v37, %v208_v31  ;;  %v213_v43 = vmax.f32 %v554_v39, 0.0  ;;  %v227_v45 = vsel %vm226_vm3, %v211_v38, 0.0  ;;  %v215_v48 = vmax.f32 %v556_v40, 0.0 }
  0xe4   :  { %v231_v47 = vadd.f32 %v213_v43, %v212_v41  ;;  %v146_v49 = vpop.f32.mrb[4].mxu0  ;;  %v199_v50 = vpop.f32.mrb[4].mxu1  ;;  %v225_v51 = vadd.f32 %v224_v42, %v210_v32  ;;  %v233_v2 = vsel %vm226_vm3, %v215_v48, 0.0  ;;  %v346_v42 = vld [vmem:[%s835_s3 + $0x8] sm:$0xff] }
  0xe5   :  { %v575_v52 = vadd.f32 %v146_v49, %v46_v44  ;;  %v148_v53 = vpop.f32.mrb[5].mxu0  ;;  %v201_v54 = vpop.f32.mrb[5].mxu1  ;;  %v597_v9 = vadd.f32 %v199_v50, %v46_v44 }
  0xe6   :  { %v577_v55 = vadd.f32 %v148_v53, %v46_v44  ;;  %v150_v56 = vpop.f32.mrb[6].mxu0  ;;  %v203_v57 = vpop.f32.mrb[6].mxu1  ;;  %v228_v58 = vadd.f32 %v227_v45, %v225_v51  ;;  %v232_v59 = vadd.f32 %v231_v47, %v214_v46  ;;  %v602_v11 = vadd.f32 %v201_v54, %v46_v44  ;;  %v385_v44 = vld [vmem:[%s836_s4] sm:$0xff] }
  0xe7   :  { %v581_v60 = vadd.f32 %v150_v56, %v51_v18  ;;  %v583_v61 = vadd.f32 %v203_v57, %v51_v18  ;;  %v152_v62 = vpop.f32.mrb[7].mxu0  ;;  %v205_v63 = vpop.f32.mrb[7].mxu1  ;;  %v216_v3 = vmax.f32 %v575_v52, 0.0  ;;  %v218_v17 = vmax.f32 %v597_v9, 0.0 }
  0xe8   :  { %v585_v0 = vadd.f32 %v152_v62, %v51_v18  ;;  %v587_v1 = vadd.f32 %v205_v63, %v51_v18  ;;  %229 = vadd.xlane.f32.xlu1 %v228_v58  ;;  %v217_v4 = vmax.f32 %v577_v55, 0.0  ;;  %v234_v6 = vadd.f32 %v233_v2, %v232_v59 }
  0xe9   :  { %v220_v5 = vmax.f32 %v581_v60, 0.0  ;;  %v222_v7 = vmax.f32 %v583_v61, 0.0  ;;  %v219_v19 = vmax.f32 %v602_v11, 0.0 }
  0xea   :  { %v221_v8 = vmax.f32 %v585_v0, 0.0  ;;  %235 = vadd.xlane.f32.xlu0 %v234_v6  ;;  %v223_v13 = vmax.f32 %v587_v1, 0.0  ;;  %v237_v14 = vadd.f32 %v217_v4, %v216_v3 }
  0xeb   :  { %v243_v10 = vsel %vm86_vm0, %v220_v5, 0.0  ;;  %v246_v16 = vsel %vm86_vm0, %v222_v7, 0.0  ;;  %v239_v25 = vsel %vm226_vm3, %v219_v19, 0.0 }
  0xec   :  { %v244_v12 = vsel %vm86_vm0, %v221_v8, 0.0  ;;  %v249_v20 = vsel %vm248_vm4, %v223_v13, 0.0  ;;  %v238_v22 = vadd.f32 %v237_v14, %v218_v17 }
  0xed   :  { %v245_v15 = vadd.f32 %v244_v12, %v243_v10 }
  0xee   :  { %v240_v26 = vadd.f32 %v239_v25, %v238_v22 }
  0xef   :  { %v247_v18 = vadd.f32 %v246_v16, %v245_v15 }
  0xf1   :  { %v250_v21 = vadd.f32 %v249_v20, %v247_v18 }
  0xf3   :  { %251 = vadd.xlane.f32.xlu0 %v250_v21 }
  0xf7   :  { %241 = vadd.xlane.f32.xlu0 %v240_v26 }
  0xf9   :  { %351 = vperm.xlu1 %458, %v345_v29  }
  0xfd   :  { %361 = vperm.xlu1 %458, %v347_v30   ;;  %v388_v30 = vld [vmem:[%s836_s4 + $0x18] sm:$0xf] }
 0x101   :  { %366 = vperm.xlu1 %458, %v348_v35   ;;  %v387_v35 = vld [vmem:[%s836_s4 + $0x10] sm:$0xff] }
 0x105   :  { %396 = vperm.xlu1 %458, %v386_v36  }
 0x10d   :  { %356 = vperm.xlu0 %457, %v346_v42  }
 0x111   :  { %391 = vperm.xlu0 %457, %v385_v44  }
 0x175   :  { %v230_v45 = vpop.xlane.xlu1 %229 }
 0x176   :  { %v254_v47 = vmul.f32 0.0025510204, %v230_v45 }
 0x177   :  { %v236_v51 = vpop.xlane.xlu0 %235 }
 0x178   :  { %v645_v49 = vsub.f32 %v208_v31, %v254_v47  ;;  %v649_v50 = vsub.f32 %v209_v37, %v254_v47  ;;  %v653_v53 = vsub.f32 %v210_v32, %v254_v47  ;;  %v657_v54 = vsub.f32 %v211_v38, %v254_v47 }
 0x179   :  { %v255_v56 = vmul.f32 0.0025510204, %v236_v51  ;;  %v352_v36 = vpop.permute.xlu1 %351 }
 0x17a   :  { %v274_v57 = vmul.f32 %v645_v49, %v645_v49  ;;  %v275_v23 = vmul.f32 %v649_v50, %v649_v50  ;;  %v277_v27 = vmul.f32 %v657_v54, %v657_v54  ;;  %v276_v37 = vmul.f32 %v653_v53, %v653_v53 }
 0x17b   :  { %v667_v31 = vsub.f32 %v212_v41, %v255_v56  ;;  %v671_v24 = vsub.f32 %v213_v43, %v255_v56  ;;  %v675_v28 = vsub.f32 %v214_v46, %v255_v56  ;;  %v679_v32 = vsub.f32 %v215_v48, %v255_v56 }
 0x17c   :  { %v290_v38 = vadd.f32 %v275_v23, %v274_v57  ;;  %v292_v43 = vsel %vm226_vm3, %v277_v27, 0.0 }
 0x17d   :  { %v278_v33 = vmul.f32 %v667_v31, %v667_v31  ;;  %v279_v39 = vmul.f32 %v671_v24, %v671_v24  ;;  %v281_v34 = vmul.f32 %v679_v32, %v679_v32  ;;  %v280_v40 = vmul.f32 %v675_v28, %v675_v28  ;;  %v752_v42 = vpop.permute.xlu1 %361 }
 0x17e   :  { %v291_v41 = vadd.f32 %v290_v38, %v276_v37 }
 0x17f   :  { %v296_v46 = vadd.f32 %v279_v39, %v278_v33  ;;  %v298_v63 = vsel %vm226_vm3, %v281_v34, 0.0 }
 0x180   :  { %v252_v48 = vpop.xlane.xlu0 %251  ;;  %v293_v58 = vadd.f32 %v292_v43, %v291_v41 }
 0x181   :  { %v257_v59 = vmul.f32 0.0025510204, %v252_v48  ;;  %v297_v62 = vadd.f32 %v296_v46, %v280_v40  ;;  %v754_v44 = vpop.permute.xlu1 %366 }
 0x182   :  { %294 = vadd.xlane.f32.xlu1 %v293_v58 }
 0x183   :  { %v695_v2 = vsub.f32 %v220_v5, %v257_v59  ;;  %v699_v6 = vsub.f32 %v221_v8, %v257_v59  ;;  %v299_v10 = vadd.f32 %v298_v63, %v297_v62  ;;  %v703_v12 = vsub.f32 %v222_v7, %v257_v59 }
 0x184   :  { %v242_v14 = vpop.xlane.xlu0 %241  ;;  %v707_v15 = vsub.f32 %v223_v13, %v257_v59 }
 0x185   :  { %300 = vadd.xlane.f32.xlu0 %v299_v10  ;;  %v256_v16 = vmul.f32 0.0025510204, %v242_v14  ;;  %v286_v60 = vmul.f32 %v695_v2, %v695_v2  ;;  %v287_v0 = vmul.f32 %v699_v6, %v699_v6  ;;  %v288_v5 = vmul.f32 %v703_v12, %v703_v12  ;;  %v397_v47 = vpop.permute.xlu1 %396 }
 0x186   :  { %v289_v61 = vmul.f32 %v707_v15, %v707_v15 }
 0x187   :  { %v719_v7 = vsub.f32 %v216_v3, %v256_v16  ;;  %v723_v1 = vsub.f32 %v217_v4, %v256_v16  ;;  %v308_v8 = vsel %vm86_vm0, %v286_v60, 0.0  ;;  %v309_v13 = vsel %vm86_vm0, %v287_v0, 0.0 }
 0x188   :  { %v310_v18 = vadd.f32 %v309_v13, %v308_v8  ;;  %v729_v20 = vsub.f32 %v218_v17, %v256_v16  ;;  %v311_v21 = vsel %vm86_vm0, %v288_v5, 0.0  ;;  %v734_v52 = vsub.f32 %v219_v19, %v256_v16 }
 0x189   :  { %v282_v55 = vmul.f32 %v719_v7, %v719_v7  ;;  %v283_v3 = vmul.f32 %v723_v1, %v723_v1  ;;  %v313_v22 = vsel %vm248_vm4, %v289_v61, 0.0 }
 0x18a   :  { %v312_v4 = vadd.f32 %v311_v21, %v310_v18  ;;  %v284_v9 = vmul.f32 %v729_v20, %v729_v20  ;;  %v285_v17 = vmul.f32 %v734_v52, %v734_v52 }
 0x18b   :  { %v302_v25 = vadd.f32 %v283_v3, %v282_v55 }
 0x18c   :  { %v314_v26 = vadd.f32 %v313_v22, %v312_v4  ;;  %v304_v19 = vsel %vm226_vm3, %v285_v17, 0.0  ;;  %v357_v45 = vpop.permute.xlu0 %356 }
 0x18d   :  { %v303_v11 = vadd.f32 %v302_v25, %v284_v9 }
 0x18e   :  { %315 = vadd.xlane.f32.xlu0 %v314_v26 }
 0x18f   :  { %v305_v29 = vadd.f32 %v304_v19, %v303_v11 }
 0x190   :  { %v392_v51 = vpop.permute.xlu0 %391 }
 0x191   :  { %306 = vadd.xlane.f32.xlu1 %v305_v29 }
 0x1a2   :  { %406 = vperm.xlu1 %458, %v388_v30  }
 0x1a4   :  { %401 = vperm.xlu0 %457, %v387_v35  }
 0x20f   :  { %v295_v56 = vpop.xlane.xlu1 %294 }
 0x210   :  { %v317_v57 = vmul.f32 0.0025510204, %v295_v56 }
 0x212   :  { %v321_v23 = vadd.f32 1e-05, %v317_v57  ;;  %v301_v27 = vpop.xlane.xlu0 %300 }
 0x213   :  { %v318_v37 = vmul.f32 0.0025510204, %v301_v27 }
 0x214   :  { %467 = vrsqrt.f32 %v321_v23 }
 0x215   :  { %v322_v38 = vadd.f32 1e-05, %v318_v37 }
 0x217   :  { %469 = vrsqrt.f32 %v322_v38 }
 0x21b   :  { %v316_v33 = vpop.xlane.xlu0 %315 }
 0x21c   :  { %v320_v39 = vmul.f32 0.0025510204, %v316_v33 }
 0x21e   :  { %v468_v41 = vpop.eup %467  ;;  %v324_v34 = vadd.f32 1e-05, %v320_v39  ;;  %v307_v43 = vpop.xlane.xlu1 %306 }
 0x21f   :  { %v329_v40 = vmul.f32 %v468_v41, %v645_v49  ;;  %v330_v46 = vmul.f32 %v468_v41, %v649_v50  ;;  %v331_v48 = vmul.f32 %v468_v41, %v653_v53  ;;  %v332_v58 = vmul.f32 %v468_v41, %v657_v54 }
 0x220   :  { %471 = vrsqrt.f32 %v324_v34  ;;  %v319_v59 = vmul.f32 0.0025510204, %v307_v43 }
 0x221   :  { %v470_v62 = vpop.eup %469  ;;  %v369_v63 = vmul.f32 %v352_v36, %v329_v40  ;;  %v370_v10 = vmul.f32 %v352_v36, %v330_v46  ;;  %v371_v14 = vmul.f32 %v352_v36, %v331_v48  ;;  %v372_v16 = vmul.f32 %v352_v36, %v332_v58 }
 0x222   :  { %v333_v60 = vmul.f32 %v470_v62, %v667_v31  ;;  %v334_v0 = vmul.f32 %v470_v62, %v671_v24  ;;  %v335_v5 = vmul.f32 %v470_v62, %v675_v28  ;;  %v336_v49 = vmul.f32 %v470_v62, %v679_v32  ;;  %v407_v29 = vpop.permute.xlu1 %406 }
 0x223   :  { %v409_v50 = vadd.f32 %v392_v51, %v369_v63  ;;  %v410_v61 = vadd.f32 %v392_v51, %v370_v10  ;;  %v411_v53 = vadd.f32 %v392_v51, %v371_v14  ;;  %v412_v8 = vadd.f32 %v392_v51, %v372_v16  ;;  %v402_v23 = vpop.permute.xlu0 %401 }
 0x224   :  { %v373_v54 = vmul.f32 %v357_v45, %v333_v60  ;;  %v374_v13 = vmul.f32 %v357_v45, %v334_v0  ;;  %v375_v18 = vmul.f32 %v357_v45, %v335_v5  ;;  %v376_v21 = vmul.f32 %v357_v45, %v336_v49 }
 0x225   :  { %425 = vst [vmem:[%s837_s5] sm:$0xff] %v409_v50  ;;  %426 = vst [vmem:[%s837_s5 + $0x8] sm:$0xff] %v410_v61  ;;  %v323_v31 = vadd.f32 1e-05, %v319_v59 }
 0x226   :  { %427 = vst [vmem:[%s837_s5 + $0x10] sm:$0xff] %v411_v53  ;;  %428 = vst.msk [vmem:[%s837_s5 + $0x18] sm:$0xff] %vm226_vm3, %v412_v8  ;;  %v413_v24 = vadd.f32 %v397_v47, %v373_v54  ;;  %v414_v28 = vadd.f32 %v397_v47, %v374_v13  ;;  %v415_v32 = vadd.f32 %v397_v47, %v375_v18 }
 0x227   :  { %v416_v55 = vadd.f32 %v397_v47, %v376_v21  ;;  %473 = vrsqrt.f32 %v323_v31 }
 0x228   :  { %429 = vst [vmem:[%s837_s5 + $0x20] sm:$0xff] %v413_v24  ;;  %430 = vst [vmem:[%s837_s5 + $0x28] sm:$0xff] %v414_v28 }
 0x229   :  { %431 = vst [vmem:[%s837_s5 + $0x30] sm:$0xff] %v415_v32  ;;  %432 = vst.msk [vmem:[%s837_s5 + $0x38] sm:$0xff] %vm226_vm3, %v416_v55 }
 0x22a   :  { %v472_v3 = vpop.eup %471 }
 0x22b   :  { %v341_v4 = vmul.f32 %v472_v3, %v695_v2  ;;  %v342_v22 = vmul.f32 %v472_v3, %v699_v6  ;;  %v343_v9 = vmul.f32 %v472_v3, %v703_v12  ;;  %v344_v17 = vmul.f32 %v472_v3, %v707_v15 }
 0x22d   :  { %v381_v25 = vmul.f32 %v754_v44, %v341_v4  ;;  %v382_v26 = vmul.f32 %v754_v44, %v342_v22  ;;  %v383_v11 = vmul.f32 %v754_v44, %v343_v9  ;;  %v384_v19 = vmul.f32 %v754_v44, %v344_v17 }
 0x22f   :  { %v421_v30 = vadd.f32 %v407_v29, %v381_v25  ;;  %v422_v35 = vadd.f32 %v407_v29, %v382_v26  ;;  %v423_v36 = vadd.f32 %v407_v29, %v383_v11  ;;  %v424_v45 = vadd.f32 %v407_v29, %v384_v19 }
 0x231   :  { %v474_v2 = vpop.eup %473  ;;  %437 = vst [vmem:[%s837_s5 + $0x60] sm:$0xf] %v421_v30  ;;  %438 = vst [vmem:[%s837_s5 + $0x68] sm:$0xf] %v422_v35 }
 0x232   :  { %439 = vst [vmem:[%s837_s5 + $0x70] sm:$0xf] %v423_v36  ;;  %440 = vst.msk [vmem:[%s837_s5 + $0x78] sm:$0xf] %vm248_vm4, %v424_v45  ;;  %v337_v6 = vmul.f32 %v474_v2, %v719_v7  ;;  %v338_v12 = vmul.f32 %v474_v2, %v723_v1  ;;  %v339_v15 = vmul.f32 %v474_v2, %v729_v20 }
 0x233   :  { %v340_v44 = vmul.f32 %v474_v2, %v734_v52 }
 0x234   :  { %v377_v47 = vmul.f32 %v752_v42, %v337_v6  ;;  %v378_v51 = vmul.f32 %v752_v42, %v338_v12  ;;  %v379_v56 = vmul.f32 %v752_v42, %v339_v15 }
 0x235   :  { %v380_v57 = vmul.f32 %v752_v42, %v340_v44 }
 0x236   :  { %v417_v27 = vadd.f32 %v402_v23, %v377_v47  ;;  %v418_v37 = vadd.f32 %v402_v23, %v378_v51  ;;  %v419_v38 = vadd.f32 %v402_v23, %v379_v56 }
 0x237   :  { %v420_v33 = vadd.f32 %v402_v23, %v380_v57 }
 0x238   :  { %433 = vst [vmem:[%s837_s5 + $0x40] sm:$0xff] %v417_v27  ;;  %434 = vst [vmem:[%s837_s5 + $0x48] sm:$0xff] %v418_v37 }
 0x239   :  { %435 = vst [vmem:[%s837_s5 + $0x50] sm:$0xff] %v419_v38  ;;  %436 = vst.msk [vmem:[%s837_s5 + $0x58] sm:$0xff] %vm226_vm3, %v420_v33 }

// kernel: encoder_forward.4
= control target key start
LH: loop header
LB: loop body
LE: loop exit
PB: predicated region body
PF: predicated region fallthrough
CT: control target
= control target key end

     0   :  { %v693_v1 = vmov 0   ;;  %vm240_vm0 = vcmask 1014784   ;;  %vm253_vm1 = vcmask 1045504   ;;  %vm330_vm2 = vcmask 801792   ;;  %s1031_s0 = inlined_call_operand.vmem [shape: bf16[252,98], index: 0, kind: input, shape index: {}]   ;;  %s1032_s1 = inlined_call_operand.vmem [shape: bf16[64,252], index: 1, kind: input, shape index: {}]   ;;  %s1033_s2 = inlined_call_operand.vmem [shape: f32[64,1], index: 2, kind: input, shape index: {}]   ;;  %s1034_s3 = inlined_call_operand.vmem [shape: f32[64,1], index: 3, kind: input, shape index: {}]   ;;  %s1035_s4 = inlined_call_operand.vmem [shape: f32[64,1], index: 4, kind: input, shape index: {}]   ;;  %s1036_s5 = inlined_call_operand.vmem [shape: f32[64,98], index: 5, kind: output, shape index: {}]  }
   0x1   :  { %v649_v0 = vld [vmem:[%s1031_s0 + $0x40] sm:$0xff]   ;;  %648 = vset.pattern.permute.xlu1 %v693_v1  ;;  %647 = vset.pattern.permute.xlu0 %v693_v1  ;;  %v651_v3 = vld [vmem:[%s1031_s0 + $0x48] sm:$0xff]   ;;  %v653_v5 = vld [vmem:[%s1031_s0 + $0x50] sm:$0xff]  }
   0x2   :  { %v650_v2 = vld [vmem:[%s1031_s0] sm:$0xff]   ;;  %588 = vmatprep.subr.bf16.mxu0 %v649_v0  ;;  %628 = vmatprep.subr.bf16.mxu1 %v649_v0  ;;  %v652_v4 = vld [vmem:[%s1031_s0 + $0x8] sm:$0xff]   ;;  %v654_v6 = vld [vmem:[%s1031_s0 + $0x10] sm:$0xff]  }
   0x3   :  { %589 = vmatpush3.bf16.msra.mxu0 %v650_v2  ;;  %636 = vmatpush3.bf16.msra.mxu1 %v650_v2  ;;  %v655_v7 = vld [vmem:[%s1031_s0 + $0x58] sm:$0xff]   ;;  %v657_v9 = vld [vmem:[%s1031_s0 + $0x60] sm:$0xff]   ;;  %v659_v11 = vld [vmem:[%s1031_s0 + $0x68] sm:$0xff]  }
   0x4   :  { %590 = vmatprep.subr.bf16.mxu0 %v651_v3  ;;  %629 = vmatprep.subr.bf16.mxu1 %v651_v3  ;;  %v656_v8 = vld [vmem:[%s1031_s0 + $0x18] sm:$0xff]   ;;  %v658_v10 = vld [vmem:[%s1031_s0 + $0x20] sm:$0xff]   ;;  %v660_v14 = vld [vmem:[%s1031_s0 + $0x28] sm:$0xff]  }
   0x5   :  { %v667_v12 = vld [vmem:[%s1032_s1 + $0x4] ss:$8 sps:$4 sm:$0xff]   ;;  %v661_v15 = vld [vmem:[%s1031_s0 + $0x70] sm:$0xff]   ;;  %v64_v19 = vld [vmem:[%s1033_s2 + $0x18] sm:$0xff] }
   0x6   :  { %v670_v13 = vld [vmem:[%s1032_s1 + $0x24] ss:$8 sps:$4 sm:$0xff]   ;;  %584 = vmatprep.mubr.msk.bf16.mxu0 %vm240_vm0, %v667_v12  ;;  %v63_v16 = vld [vmem:[%s1033_s2 + $0x10] sm:$0xff]  ;;  %v663_v20 = vld [vmem:[%s1031_s0 + $0x78] sm:$0x3f]  }
   0x7   :  { %591 = vmatpush3.bf16.msra.mxu0 %v652_v4  ;;  %637 = vmatpush3.bf16.msra.mxu1 %v652_v4  ;;  %v61_v17 = vld [vmem:[%s1033_s2] sm:$0xff]  ;;  %v662_v18 = vld [vmem:[%s1031_s0 + $0x30] sm:$0xff]   ;;  %v62_v21 = vld [vmem:[%s1033_s2 + $0x8] sm:$0xff] }
   0x8   :  { %592 = vmatprep.subr.bf16.mxu0 %v653_v5  ;;  %630 = vmatprep.subr.bf16.mxu1 %v653_v5  ;;  %v664_v22 = vld [vmem:[%s1031_s0 + $0x38] sm:$0xff]   ;;  %v66_v23 = vld [vmem:[%s1033_s2 + $0x28] sm:$0xff]  ;;  %v65_v26 = vld [vmem:[%s1033_s2 + $0x20] sm:$0xff] }
   0x9   :  { %586 = vmatprep.mubr.msk.bf16.mxu1 %vm240_vm0, %v670_v13  ;;  %81 = vperm.xlu1 %648, %v63_v16   ;;  %v665_v24 = vld [vmem:[%s1032_s1] ss:$8 sps:$4 sm:$0xff]   ;;  %v671_v27 = vld [vmem:[%s1032_s1 + $0x14] ss:$8 sps:$4 sm:$0xff]   ;;  %v675_v32 = vld [vmem:[%s1032_s1 + $0x10] ss:$8 sps:$4 sm:$0xff]  }
   0xa   :  { %71 = vperm.xlu0 %647, %v61_v17   ;;  %v668_v25 = vld [vmem:[%s1032_s1 + $0x20] ss:$8 sps:$4 sm:$0xff]   ;;  %v673_v28 = vld [vmem:[%s1032_s1 + $0x34] ss:$8 sps:$4 sm:$0xff]   ;;  %v676_v33 = vld [vmem:[%s1032_s1 + $0x30] ss:$8 sps:$4 sm:$0xff]  }
   0xb   :  { %593 = vmatpush3.bf16.msra.mxu0 %v654_v6  ;;  %638 = vmatpush3.bf16.msra.mxu1 %v654_v6  ;;  %v68_v29 = vld [vmem:[%s1033_s2 + $0x38] sm:$0xff]  ;;  %v67_v30 = vld [vmem:[%s1033_s2 + $0x30] sm:$0xff]  ;;  %v436_v31 = vld [vmem:[%s1034_s3] sm:$0xff] }
   0xc   :  { %594 = vmatprep.subr.bf16.mxu0 %v655_v7  ;;  %631 = vmatprep.subr.bf16.mxu1 %v655_v7  ;;  %v437_v34 = vld [vmem:[%s1034_s3 + $0x8] sm:$0xff]  ;;  %v438_v35 = vld [vmem:[%s1034_s3 + $0x10] sm:$0xff]  ;;  %v440_v36 = vld [vmem:[%s1034_s3 + $0x20] sm:$0xff] }
   0xd   :  { %86 = vperm.xlu1 %648, %v64_v19   ;;  %v439_v37 = vld [vmem:[%s1034_s3 + $0x18] sm:$0xff]  ;;  %v441_v38 = vld [vmem:[%s1034_s3 + $0x28] sm:$0xff] }
   0xe   :  { %76 = vperm.xlu0 %647, %v62_v21  }
   0xf   :  { %595 = vmatpush3.bf16.msra.mxu0 %v656_v8  ;;  %639 = vmatpush3.bf16.msra.mxu1 %v656_v8 }
  0x10   :  { %596 = vmatprep.subr.bf16.mxu0 %v657_v9  ;;  %632 = vmatprep.subr.bf16.mxu1 %v657_v9 }
  0x11   :  { %96 = vperm.xlu1 %648, %v66_v23  }
  0x12   :  { %91 = vperm.xlu0 %647, %v65_v26  }
  0x13   :  { %597 = vmatpush3.bf16.msra.mxu0 %v658_v10  ;;  %640 = vmatpush3.bf16.msra.mxu1 %v658_v10 }
  0x14   :  { %598 = vmatprep.subr.bf16.mxu0 %v659_v11  ;;  %633 = vmatprep.subr.bf16.mxu1 %v659_v11 }
  0x15   :  { %106 = vperm.xlu1 %648, %v68_v29  }
  0x16   :  { %101 = vperm.xlu0 %647, %v67_v30  }
  0x17   :  { %599 = vmatpush3.bf16.msra.mxu0 %v660_v14  ;;  %641 = vmatpush3.bf16.msra.mxu1 %v660_v14 }
  0x18   :  { %600 = vmatprep.subr.bf16.mxu0 %v661_v15  ;;  %634 = vmatprep.subr.bf16.mxu1 %v661_v15 }
  0x19   :  { %446 = vperm.xlu1 %648, %v436_v31   ;;  %v443_v31 = vld [vmem:[%s1034_s3 + $0x38] sm:$0xff] }
  0x1a   :  { %451 = vperm.xlu0 %647, %v437_v34   ;;  %v497_v34 = vld [vmem:[%s1035_s4 + $0x28] sm:$0xff] }
  0x1b   :  { %601 = vmatpush3.bf16.msra.mxu0 %v662_v18  ;;  %642 = vmatpush3.bf16.msra.mxu1 %v662_v18 }
  0x1c   :  { %644 = vmatprep.subr.msk.bf16.mxu0 %vm253_vm1, %v663_v20  ;;  %645 = vmatprep.subr.msk.bf16.mxu1 %vm253_vm1, %v663_v20 }
  0x1d   :  { %456 = vperm.xlu1 %648, %v438_v35   ;;  %v442_v35 = vld [vmem:[%s1034_s3 + $0x30] sm:$0xff] }
  0x1e   :  { %466 = vperm.xlu0 %647, %v440_v36   ;;  %v492_v36 = vld [vmem:[%s1035_s4] sm:$0xff] }
  0x1f   :  { %603 = vmatpush3.bf16.msra.mxu0 %v664_v22  ;;  %643 = vmatpush3.bf16.msra.mxu1 %v664_v22 }
  0x21   :  { %461 = vperm.xlu1 %648, %v439_v37   ;;  %v494_v37 = vld [vmem:[%s1035_s4 + $0x10] sm:$0xff] }
  0x22   :  { %290 = vmatmul.mubr.bf16.vlgmr.msra.gmra.mrb[0].mxu0 %v665_v24  ;;  %306 = vmatmul.mubr.bf16.vlgmr.msra.gmra.mrb[0].mxu1 %v668_v25 }
  0x23   :  { %585 = vmatprep.mubr.msk.bf16.mxu0 %vm240_vm0, %v671_v27  ;;  %587 = vmatprep.mubr.msk.bf16.mxu1 %vm240_vm0, %v673_v28 }
  0x25   :  { %471 = vperm.xlu1 %648, %v441_v38   ;;  %v496_v38 = vld [vmem:[%s1035_s4 + $0x20] sm:$0xff] }
  0x2a   :  { %298 = vmatmul.mubr.bf16.gmra.mrb[4].mxu0 %v675_v32  ;;  %314 = vmatmul.mubr.bf16.gmra.mrb[4].mxu1 %v676_v33  ;;  %v493_v32 = vld [vmem:[%s1035_s4 + $0x8] sm:$0xff]  ;;  %v495_v33 = vld [vmem:[%s1035_s4 + $0x18] sm:$0xff] }
  0x88   :  { %v82_v40 = vpop.permute.xlu1 %81 }
  0x89   :  { %v72_v39 = vpop.permute.xlu0 %71 }
  0x8c   :  { %v87_v42 = vpop.permute.xlu1 %86 }
  0x8d   :  { %v77_v41 = vpop.permute.xlu0 %76 }
  0x90   :  { %v97_v58 = vpop.permute.xlu1 %96 }
  0x91   :  { %v92_v43 = vpop.permute.xlu0 %91 }
  0x94   :  { %v107_v23 = vpop.permute.xlu1 %106 }
  0x95   :  { %v102_v63 = vpop.permute.xlu0 %101 }
  0xf5   :  { %v604_v44 = vpop.f32.mrb[0].mxu0  ;;  %v616_v45 = vpop.f32.mrb[0].mxu1 }
  0xf6   :  { %v605_v46 = vpop.f32.mrb[1].mxu0  ;;  %v617_v47 = vpop.f32.mrb[1].mxu1 }
  0xf7   :  { %v606_v48 = vadd.f32 %v605_v46, %v604_v44  ;;  %v618_v49 = vadd.f32 %v617_v47, %v616_v45  ;;  %v607_v50 = vpop.f32.mrb[2].mxu0  ;;  %v619_v51 = vpop.f32.mrb[2].mxu1 }
  0xf8   :  { %v608_v52 = vpop.f32.mrb[3].mxu0  ;;  %v620_v53 = vpop.f32.mrb[3].mxu1 }
  0xf9   :  { %v842_v54 = vadd.f32 %v606_v48, %v72_v39  ;;  %v844_v55 = vadd.f32 %v618_v49, %v92_v43  ;;  %v609_v56 = vadd.f32 %v608_v52, %v607_v50  ;;  %v621_v57 = vadd.f32 %v620_v53, %v619_v51  ;;  %v908_v39 = vpop.permute.xlu1 %446 }
  0xfb   :  { %v846_v59 = vadd.f32 %v609_v56, %v77_v41  ;;  %v848_v60 = vadd.f32 %v621_v57, %v97_v58  ;;  %v326_v61 = vmax.f32 %v844_v55, 0.0  ;;  %v322_v62 = vmax.f32 %v842_v54, 0.0  ;;  %v912_v41 = vpop.permute.xlu0 %451 }
  0xfd   :  { %v610_v0 = vpop.f32.mrb[4].mxu0  ;;  %v622_v1 = vpop.f32.mrb[4].mxu1  ;;  %v343_v2 = vsel %vm330_vm2, %v326_v61, 0.0  ;;  %v331_v3 = vsel %vm330_vm2, %v322_v62, 0.0  ;;  %v323_v4 = vmax.f32 %v846_v59, 0.0  ;;  %v327_v5 = vmax.f32 %v848_v60, 0.0 }
  0xfe   :  { %v623_v6 = vpop.f32.mrb[5].mxu1  ;;  %344 = vadd.xlane.f32.xlu1 %v343_v2  ;;  %v611_v7 = vpop.f32.mrb[5].mxu0  ;;  %332 = vadd.xlane.f32.xlu0 %v331_v3 }
  0xff   :  { %v624_v8 = vadd.f32 %v623_v6, %v622_v1  ;;  %v612_v9 = vadd.f32 %v611_v7, %v610_v0  ;;  %v613_v10 = vpop.f32.mrb[6].mxu0  ;;  %v625_v11 = vpop.f32.mrb[6].mxu1  ;;  %v334_v14 = vsel %vm330_vm2, %v323_v4, 0.0  ;;  %v346_v15 = vsel %vm330_vm2, %v327_v5, 0.0 }
 0x100   :  { %v614_v12 = vpop.f32.mrb[7].mxu0  ;;  %v626_v13 = vpop.f32.mrb[7].mxu1 }
 0x101   :  { %v866_v16 = vadd.f32 %v624_v8, %v102_v63  ;;  %v868_v17 = vadd.f32 %v612_v9, %v82_v40  ;;  %v615_v18 = vadd.f32 %v614_v12, %v613_v10  ;;  %v627_v19 = vadd.f32 %v626_v13, %v625_v11  ;;  %v910_v40 = vpop.permute.xlu1 %456  ;;  %v916_v43 = vpop.permute.xlu0 %466 }
 0x102   :  { %335 = vadd.xlane.f32.xlu1 %v334_v14  ;;  %347 = vadd.xlane.f32.xlu0 %v346_v15 }
 0x103   :  { %v870_v20 = vadd.f32 %v615_v18, %v87_v42  ;;  %v328_v21 = vmax.f32 %v866_v16, 0.0  ;;  %v324_v22 = vmax.f32 %v868_v17, 0.0  ;;  %v874_v24 = vadd.f32 %v627_v19, %v107_v23 }
 0x105   :  { %v349_v25 = vsel %vm330_vm2, %v328_v21, 0.0  ;;  %v337_v26 = vsel %vm330_vm2, %v324_v22, 0.0  ;;  %v325_v27 = vmax.f32 %v870_v20, 0.0  ;;  %v329_v29 = vmax.f32 %v874_v24, 0.0  ;;  %v914_v42 = vpop.permute.xlu1 %461 }
 0x106   :  { %350 = vadd.xlane.f32.xlu1 %v349_v25  ;;  %338 = vadd.xlane.f32.xlu0 %v337_v26 }
 0x107   :  { %v340_v28 = vsel %vm330_vm2, %v325_v27, 0.0  ;;  %v352_v30 = vsel %vm330_vm2, %v329_v29, 0.0 }
 0x109   :  { %v918_v44 = vpop.permute.xlu1 %471 }
 0x10a   :  { %341 = vadd.xlane.f32.xlu0 %v340_v28 }
 0x10e   :  { %353 = vadd.xlane.f32.xlu0 %v352_v30 }
 0x117   :  { %481 = vperm.xlu1 %648, %v443_v31  }
 0x11b   :  { %507 = vperm.xlu1 %648, %v493_v32  }
 0x11f   :  { %517 = vperm.xlu1 %648, %v495_v33  }
 0x123   :  { %527 = vperm.xlu1 %648, %v497_v34  }
 0x124   :  { %476 = vperm.xlu0 %647, %v442_v35  }
 0x128   :  { %502 = vperm.xlu0 %647, %v492_v36  }
 0x12c   :  { %512 = vperm.xlu0 %647, %v494_v37  }
 0x130   :  { %522 = vperm.xlu0 %647, %v496_v38  }
 0x18b   :  { %v345_v45 = vpop.xlane.xlu1 %344  ;;  %v333_v46 = vpop.xlane.xlu0 %332 }
 0x18c   :  { %v360_v47 = vmul.f32 0.010204081, %v345_v45  ;;  %v356_v48 = vmul.f32 0.010204081, %v333_v46 }
 0x18e   :  { %v922_v49 = vsub.f32 %v326_v61, %v360_v47  ;;  %v926_v50 = vsub.f32 %v322_v62, %v356_v48 }
 0x18f   :  { %v336_v51 = vpop.xlane.xlu1 %335  ;;  %v348_v52 = vpop.xlane.xlu0 %347 }
 0x190   :  { %v357_v53 = vmul.f32 0.010204081, %v336_v51  ;;  %v361_v56 = vmul.f32 0.010204081, %v348_v52  ;;  %v372_v57 = vmul.f32 %v926_v50, %v926_v50  ;;  %v376_v58 = vmul.f32 %v922_v49, %v922_v49 }
 0x192   :  { %v934_v63 = vsub.f32 %v323_v4, %v357_v53  ;;  %v938_v55 = vsub.f32 %v327_v5, %v361_v56  ;;  %v380_v54 = vsel %vm330_vm2, %v372_v57, 0.0  ;;  %v392_v3 = vsel %vm330_vm2, %v376_v58, 0.0 }
 0x193   :  { %v351_v61 = vpop.xlane.xlu1 %350  ;;  %381 = vadd.xlane.f32.xlu1 %v380_v54  ;;  %v339_v62 = vpop.xlane.xlu0 %338 }
 0x194   :  { %v362_v0 = vmul.f32 0.010204081, %v351_v61  ;;  %v358_v1 = vmul.f32 0.010204081, %v339_v62  ;;  %v373_v2 = vmul.f32 %v934_v63, %v934_v63  ;;  %v377_v4 = vmul.f32 %v938_v55, %v938_v55 }
 0x196   :  { %v944_v6 = vsub.f32 %v328_v21, %v362_v0  ;;  %v946_v59 = vsub.f32 %v324_v22, %v358_v1  ;;  %v383_v60 = vsel %vm330_vm2, %v373_v2, 0.0  ;;  %v395_v10 = vsel %vm330_vm2, %v377_v4, 0.0  ;;  %v499_v21 = vld [vmem:[%s1035_s4 + $0x38] sm:$0xff]  ;;  %v498_v22 = vld [vmem:[%s1035_s4 + $0x30] sm:$0xff] }
 0x197   :  { %384 = vadd.xlane.f32.xlu0 %v383_v60  ;;  %393 = vadd.xlane.f32.xlu1 %v392_v3  ;;  %v342_v5 = vpop.xlane.xlu0 %341  ;;  %v976_v23 = vpop.permute.xlu1 %481 }
 0x198   :  { %v359_v7 = vmul.f32 0.010204081, %v342_v5  ;;  %v374_v8 = vmul.f32 %v946_v59, %v946_v59  ;;  %v378_v12 = vmul.f32 %v944_v6, %v944_v6 }
 0x19a   :  { %v953_v9 = vsub.f32 %v325_v27, %v359_v7  ;;  %v386_v11 = vsel %vm330_vm2, %v374_v8, 0.0  ;;  %v398_v17 = vsel %vm330_vm2, %v378_v12, 0.0 }
 0x19b   :  { %396 = vadd.xlane.f32.xlu0 %v395_v10  ;;  %387 = vadd.xlane.f32.xlu1 %v386_v11  ;;  %v354_v13 = vpop.xlane.xlu0 %353  ;;  %v508_v25 = vpop.permute.xlu1 %507 }
 0x19c   :  { %v363_v14 = vmul.f32 0.010204081, %v354_v13  ;;  %v375_v15 = vmul.f32 %v953_v9, %v953_v9 }
 0x19e   :  { %v963_v16 = vsub.f32 %v329_v29, %v363_v14  ;;  %v389_v18 = vsel %vm330_vm2, %v375_v15, 0.0 }
 0x19f   :  { %399 = vadd.xlane.f32.xlu1 %v398_v17  ;;  %390 = vadd.xlane.f32.xlu0 %v389_v18  ;;  %v980_v27 = vpop.permute.xlu1 %517 }
 0x1a0   :  { %v379_v19 = vmul.f32 %v963_v16, %v963_v16 }
 0x1a2   :  { %v401_v20 = vsel %vm330_vm2, %v379_v19, 0.0 }
 0x1a3   :  { %402 = vadd.xlane.f32.xlu0 %v401_v20  ;;  %v978_v24 = vpop.permute.xlu0 %476  ;;  %v528_v29 = vpop.permute.xlu1 %527 }
 0x1a7   :  { %v503_v26 = vpop.permute.xlu0 %502 }
 0x1ab   :  { %v513_v28 = vpop.permute.xlu0 %512 }
 0x1af   :  { %v523_v30 = vpop.permute.xlu0 %522 }
 0x1b0   :  { %537 = vperm.xlu1 %648, %v499_v21  }
 0x1b9   :  { %532 = vperm.xlu0 %647, %v498_v22  }
 0x220   :  { %v382_v31 = vpop.xlane.xlu1 %381 }
 0x221   :  { %v404_v32 = vmul.f32 0.010204081, %v382_v31 }
 0x223   :  { %v412_v33 = vadd.f32 1e-05, %v404_v32 }
 0x224   :  { %v394_v34 = vpop.xlane.xlu1 %393  ;;  %v385_v35 = vpop.xlane.xlu0 %384 }
 0x225   :  { %677 = vrsqrt.f32 %v412_v33  ;;  %v408_v36 = vmul.f32 0.010204081, %v394_v34  ;;  %v405_v37 = vmul.f32 0.010204081, %v385_v35 }
 0x227   :  { %v416_v38 = vadd.f32 1e-05, %v408_v36  ;;  %v413_v45 = vadd.f32 1e-05, %v405_v37 }
 0x228   :  { %v388_v46 = vpop.xlane.xlu1 %387  ;;  %v397_v47 = vpop.xlane.xlu0 %396 }
 0x229   :  { %679 = vrsqrt.f32 %v416_v38  ;;  %v406_v48 = vmul.f32 0.010204081, %v388_v46  ;;  %v409_v51 = vmul.f32 0.010204081, %v397_v47 }
 0x22a   :  { %681 = vrsqrt.f32 %v413_v45 }
 0x22b   :  { %v414_v52 = vadd.f32 1e-05, %v406_v48  ;;  %v417_v53 = vadd.f32 1e-05, %v409_v51 }
 0x22c   :  { %v400_v56 = vpop.xlane.xlu1 %399  ;;  %v391_v57 = vpop.xlane.xlu0 %390 }
 0x22d   :  { %683 = vrsqrt.f32 %v414_v52  ;;  %v410_v58 = vmul.f32 0.010204081, %v400_v56  ;;  %v407_v54 = vmul.f32 0.010204081, %v391_v57 }
 0x22e   :  { %685 = vrsqrt.f32 %v417_v53 }
 0x22f   :  { %v678_v61 = vpop.eup %677  ;;  %v418_v62 = vadd.f32 1e-05, %v410_v58  ;;  %v415_v0 = vadd.f32 1e-05, %v407_v54 }
 0x230   :  { %v428_v1 = vmul.f32 %v678_v61, %v926_v50  ;;  %v403_v2 = vpop.xlane.xlu0 %402 }
 0x231   :  { %687 = vrsqrt.f32 %v418_v62  ;;  %v411_v3 = vmul.f32 0.010204081, %v403_v2 }
 0x232   :  { %v484_v60 = vmul.f32 %v908_v39, %v428_v1  ;;  %689 = vrsqrt.f32 %v415_v0 }
 0x233   :  { %v680_v4 = vpop.eup %679  ;;  %v419_v5 = vadd.f32 1e-05, %v411_v3 }
 0x234   :  { %v682_v7 = vpop.eup %681  ;;  %v540_v8 = vadd.f32 %v503_v26, %v484_v60  ;;  %v432_v10 = vmul.f32 %v680_v4, %v922_v49 }
 0x235   :  { %v429_v11 = vmul.f32 %v682_v7, %v934_v63  ;;  %691 = vrsqrt.f32 %v419_v5 }
 0x236   :  { %548 = vst.msk [vmem:[%s1036_s5] sm:$0xff] %vm330_vm2, %v540_v8  ;;  %v488_v50 = vmul.f32 %v916_v43, %v432_v10 }
 0x237   :  { %v684_v12 = vpop.eup %683  ;;  %v485_v39 = vmul.f32 %v912_v41, %v429_v11 }
 0x238   :  { %v686_v13 = vpop.eup %685  ;;  %v544_v14 = vadd.f32 %v523_v30, %v488_v50  ;;  %v430_v15 = vmul.f32 %v684_v12, %v946_v59  ;;  %v533_v22 = vpop.permute.xlu0 %532 }
 0x239   :  { %v541_v17 = vadd.f32 %v508_v25, %v485_v39  ;;  %v433_v49 = vmul.f32 %v686_v13, %v938_v55 }
 0x23a   :  { %552 = vst.msk [vmem:[%s1036_s5 + $0x20] sm:$0xff] %vm330_vm2, %v544_v14  ;;  %v486_v63 = vmul.f32 %v910_v40, %v430_v15 }
 0x23b   :  { %v688_v18 = vpop.eup %687  ;;  %549 = vst.msk [vmem:[%s1036_s5 + $0x8] sm:$0xff] %vm330_vm2, %v541_v17  ;;  %v489_v41 = vmul.f32 %v918_v44, %v433_v49 }
 0x23c   :  { %v690_v43 = vpop.eup %689  ;;  %v542_v59 = vadd.f32 %v513_v28, %v486_v63  ;;  %v434_v19 = vmul.f32 %v688_v18, %v944_v6 }
 0x23d   :  { %v545_v55 = vadd.f32 %v528_v29, %v489_v41  ;;  %v431_v20 = vmul.f32 %v690_v43, %v953_v9 }
 0x23e   :  { %550 = vst.msk [vmem:[%s1036_s5 + $0x10] sm:$0xff] %vm330_vm2, %v542_v59  ;;  %v490_v40 = vmul.f32 %v978_v24, %v434_v19  ;;  %v538_v24 = vpop.permute.xlu1 %537 }
 0x23f   :  { %v692_v21 = vpop.eup %691  ;;  %553 = vst.msk [vmem:[%s1036_s5 + $0x28] sm:$0xff] %vm330_vm2, %v545_v55  ;;  %v487_v44 = vmul.f32 %v914_v42, %v431_v20 }
 0x240   :  { %v435_v6 = vmul.f32 %v692_v21, %v963_v16  ;;  %v546_v25 = vadd.f32 %v533_v22, %v490_v40 }
 0x241   :  { %v543_v9 = vadd.f32 %v980_v27, %v487_v44 }
 0x242   :  { %v491_v26 = vmul.f32 %v976_v23, %v435_v6  ;;  %554 = vst.msk [vmem:[%s1036_s5 + $0x30] sm:$0xff] %vm330_vm2, %v546_v25 }
 0x243   :  { %551 = vst.msk [vmem:[%s1036_s5 + $0x18] sm:$0xff] %vm330_vm2, %v543_v9 }
 0x244   :  { %v547_v42 = vadd.f32 %v538_v24, %v491_v26 }
 0x246   :  { %555 = vst.msk [vmem:[%s1036_s5 + $0x38] sm:$0xff] %vm330_vm2, %v547_v42 }

// kernel: encoder_forward.5
= control target key start
LH: loop header
LB: loop body
LE: loop exit
PB: predicated region body
PF: predicated region fallthrough
CT: control target
= control target key end

     0   :  { %v1822_v1 = vmov 0   ;;  %vm653_vm0 = vcmask 523264   ;;  %vm985_vm1 = vcmask 261120   ;;  %s2644_s0 = inlined_call_operand.vmem [shape: bf16[576,32], index: 0, kind: input, shape index: {}]   ;;  %s2645_s1 = inlined_call_operand.vmem [shape: bf16[128,576], index: 1, kind: input, shape index: {}]   ;;  %s2646_s2 = inlined_call_operand.vmem [shape: f32[128,1], index: 2, kind: input, shape index: {}]   ;;  %s2647_s3 = inlined_call_operand.vmem [shape: f32[128,1], index: 3, kind: input, shape index: {}]   ;;  %s2648_s4 = inlined_call_operand.vmem [shape: f32[128,1], index: 4, kind: input, shape index: {}]   ;;  %s2649_s5 = inlined_call_operand.vmem [shape: f32[128,32], index: 5, kind: output, shape index: {}]  }
   0x1   :  { %v1698_v0 = vld [vmem:[%s2644_s0 + $0x40] sm:$0xff]   ;;  %1697 = vset.pattern.permute.xlu1 %v1822_v1  ;;  %1696 = vset.pattern.permute.xlu0 %v1822_v1  ;;  %v1702_v5 = vld [vmem:[%s2644_s0 + $0x48] sm:$0xff]   ;;  %v1706_v9 = vld [vmem:[%s2644_s0 + $0x50] sm:$0xff]  }
   0x2   :  { %v1699_v2 = vld [vmem:[%s2644_s0 + $0xc0] sm:$0xff]   ;;  %1523 = vmatprep.subr.bf16.mxu0 %v1698_v0  ;;  %v1703_v6 = vld [vmem:[%s2644_s0 + $0xc8] sm:$0xff]   ;;  %v1707_v10 = vld [vmem:[%s2644_s0 + $0xd0] sm:$0xff]  }
   0x3   :  { %v1700_v3 = vld [vmem:[%s2644_s0] sm:$0xff]   ;;  %1587 = vmatprep.subr.bf16.mxu1 %v1699_v2  ;;  %v1704_v7 = vld [vmem:[%s2644_s0 + $0x8] sm:$0xff]   ;;  %v1708_v11 = vld [vmem:[%s2644_s0 + $0x10] sm:$0xff]  }
   0x4   :  { %v1701_v4 = vld [vmem:[%s2644_s0 + $0x80] sm:$0xff]   ;;  %1524 = vmatpush3.bf16.msra.mxu0 %v1700_v3  ;;  %v1705_v8 = vld [vmem:[%s2644_s0 + $0x88] sm:$0xff]   ;;  %v1709_v12 = vld [vmem:[%s2644_s0 + $0x90] sm:$0xff]  }
   0x5   :  { %1588 = vmatpush3.bf16.msra.mxu1 %v1701_v4  ;;  %1525 = vmatprep.subr.bf16.mxu0 %v1702_v5  ;;  %v1710_v13 = vld [vmem:[%s2644_s0 + $0x58] sm:$0xff]   ;;  %v1714_v17 = vld [vmem:[%s2644_s0 + $0x60] sm:$0xff]   ;;  %v1718_v21 = vld [vmem:[%s2644_s0 + $0x68] sm:$0xff]  }
   0x6   :  { %1589 = vmatprep.subr.bf16.mxu1 %v1703_v6  ;;  %v1711_v14 = vld [vmem:[%s2644_s0 + $0xd8] sm:$0xff]   ;;  %v1715_v18 = vld [vmem:[%s2644_s0 + $0xe0] sm:$0xff]   ;;  %v1719_v22 = vld [vmem:[%s2644_s0 + $0xe8] sm:$0xff]  }
   0x7   :  { %v1712_v15 = vld [vmem:[%s2644_s0 + $0x18] sm:$0xff]   ;;  %v1716_v19 = vld [vmem:[%s2644_s0 + $0x20] sm:$0xff]   ;;  %v1720_v23 = vld [vmem:[%s2644_s0 + $0x28] sm:$0xff]  }
   0x8   :  { %1526 = vmatpush3.bf16.msra.mxu0 %v1704_v7  ;;  %v1713_v16 = vld [vmem:[%s2644_s0 + $0x98] sm:$0xff]   ;;  %v1717_v20 = vld [vmem:[%s2644_s0 + $0xa0] sm:$0xff]   ;;  %v1721_v24 = vld [vmem:[%s2644_s0 + $0xa8] sm:$0xff]  }
   0x9   :  { %1590 = vmatpush3.bf16.msra.mxu1 %v1705_v8  ;;  %1527 = vmatprep.subr.bf16.mxu0 %v1706_v9  ;;  %v1722_v25 = vld [vmem:[%s2644_s0 + $0x70] sm:$0xff]   ;;  %v1726_v29 = vld [vmem:[%s2644_s0 + $0x78] sm:$0xff]   ;;  %v1735_v36 = vld [vmem:[%s2645_s1 + $0xc] ss:$20 sps:$4 sm:$0xff]  }
   0xa   :  { %1591 = vmatprep.subr.bf16.mxu1 %v1707_v10  ;;  %v1723_v26 = vld [vmem:[%s2644_s0 + $0xf0] sm:$0xff]   ;;  %v1727_v30 = vld [vmem:[%s2644_s0 + $0xf8] sm:$0xff]   ;;  %v1736_v37 = vld [vmem:[%s2644_s0 + $0x100] sm:$0xff]   ;;  %807 = vmatprep.mubr.bf16.mxu1 %v1735_v36 }
   0xb   :  { %v1724_v27 = vld [vmem:[%s2644_s0 + $0x30] sm:$0xff]   ;;  %v1728_v31 = vld [vmem:[%s2644_s0 + $0x38] sm:$0xff]   ;;  %v1737_v38 = vld [vmem:[%s2645_s1 + $0x2c] ss:$20 sps:$4 sm:$0xff]  }
   0xc   :  { %1528 = vmatpush3.bf16.msra.mxu0 %v1708_v11  ;;  %v1725_v28 = vld [vmem:[%s2644_s0 + $0xb0] sm:$0xff]   ;;  %v1729_v32 = vld [vmem:[%s2644_s0 + $0xb8] sm:$0xff]   ;;  %v1749_v43 = vld [vmem:[%s2644_s0 + $0x108] sm:$0xff]  }
   0xd   :  { %1592 = vmatpush3.bf16.msra.mxu1 %v1709_v12  ;;  %1529 = vmatprep.subr.bf16.mxu0 %v1710_v13  ;;  %v1730_v33 = vld [vmem:[%s2645_s1] ss:$20 sps:$4 sm:$0xff]   ;;  %v1732_v34 = vld [vmem:[%s2645_s1 + $0x4] ss:$20 sps:$4 sm:$0xff]   ;;  %v1733_v35 = vld [vmem:[%s2645_s1 + $0x8] ss:$20 sps:$4 sm:$0xff]  }
   0xe   :  { %1593 = vmatprep.subr.bf16.mxu1 %v1711_v14  ;;  %710 = vmatprep.mubr.bf16.mxu0 %v1732_v34  ;;  %v1739_v39 = vld [vmem:[%s2645_s1 + $0x34] ss:$20 sps:$4 sm:$0xff]   ;;  %v1742_v41 = vld [vmem:[%s2645_s1 + $0x30] ss:$20 sps:$4 sm:$0xff]   ;;  %v1748_v46 = vld [vmem:[%s2645_s1 + $0x58] ss:$20 sps:$4 sm:$0xff]  }
   0xf   :  { %v1741_v40 = vld [vmem:[%s2645_s1 + $0x28] ss:$20 sps:$4 sm:$0xff]   ;;  %v1747_v45 = vld [vmem:[%s2645_s1 + $0x50] ss:$20 sps:$4 sm:$0xff]   ;;  %v1754_v52 = vld [vmem:[%s2645_s1 + $0x78] ss:$20 sps:$4 sm:$0xff]  }
  0x10   :  { %1530 = vmatpush3.bf16.msra.mxu0 %v1712_v15  ;;  %v1743_v42 = vld [vmem:[%s2645_s1 + $0x54] ss:$20 sps:$4 sm:$0xff]   ;;  %v1745_v44 = vld [vmem:[%s2645_s1 + $0x5c] ss:$20 sps:$4 sm:$0xff]   ;;  %v1752_v49 = vld [vmem:[%s2645_s1 + $0x84] ss:$20 sps:$4 sm:$0xff]  }
  0x11   :  { %1594 = vmatpush3.bf16.msra.mxu1 %v1713_v16  ;;  %1531 = vmatprep.subr.bf16.mxu0 %v1714_v17  ;;  %v1762_v47 = vld [vmem:[%s2644_s0 + $0x110] sm:$0xff]   ;;  %v1775_v50 = vld [vmem:[%s2644_s0 + $0x118] sm:$0xff]   ;;  %v141_v53 = vld [vmem:[%s2646_s2] sm:$0xff] }
  0x12   :  { %1595 = vmatprep.subr.bf16.mxu1 %v1715_v18  ;;  %v1750_v48 = vld [vmem:[%s2645_s1 + $0x7c] ss:$20 sps:$4 sm:$0xff]   ;;  %159 = vperm.xlu0 %1696, %v141_v53   ;;  %v1755_v55 = vld [vmem:[%s2645_s1 + $0x80] ss:$20 sps:$4 sm:$0xff]   ;;  %v1756_v56 = vld [vmem:[%s2645_s1 + $0xa4] ss:$20 sps:$4 sm:$0xff]  }
  0x13   :  { %v143_v51 = vld [vmem:[%s2646_s2 + $0x10] sm:$0xff]  ;;  %v144_v54 = vld [vmem:[%s2646_s2 + $0x18] sm:$0xff]  ;;  %v1758_v57 = vld [vmem:[%s2645_s1 + $0xac] ss:$20 sps:$4 sm:$0xff]  }
  0x14   :  { %1532 = vmatpush3.bf16.msra.mxu0 %v1716_v19  ;;  %169 = vperm.xlu1 %1697, %v143_v51   ;;  %v142_v58 = vld [vmem:[%s2646_s2 + $0x8] sm:$0xff]  ;;  %v145_v60 = vld [vmem:[%s2646_s2 + $0x20] sm:$0xff]  ;;  %v148_v0 = vld [vmem:[%s2646_s2 + $0x38] sm:$0xff] }
  0x15   :  { %1596 = vmatpush3.bf16.msra.mxu1 %v1717_v20  ;;  %1533 = vmatprep.subr.bf16.mxu0 %v1718_v21  ;;  %v146_v59 = vld [vmem:[%s2646_s2 + $0x28] sm:$0xff]  ;;  %v1760_v61 = vld [vmem:[%s2645_s1 + $0xa0] ss:$20 sps:$4 sm:$0xff]   ;;  %v152_v6 = vld [vmem:[%s2646_s2 + $0x58] sm:$0xff] }
  0x16   :  { %1597 = vmatprep.subr.bf16.mxu1 %v1719_v22  ;;  %164 = vperm.xlu0 %1696, %v142_v58   ;;  %v1761_v62 = vld [vmem:[%s2645_s1 + $0xa8] ss:$20 sps:$4 sm:$0xff]   ;;  %v1763_v63 = vld [vmem:[%s2645_s1 + $0xcc] ss:$20 sps:$4 sm:$0xff]   ;;  %v147_v1 = vld [vmem:[%s2646_s2 + $0x30] sm:$0xff] }
  0x17   :  { %v1765_v2 = vld [vmem:[%s2645_s1 + $0xd4] ss:$20 sps:$4 sm:$0xff]   ;;  %v149_v4 = vld [vmem:[%s2646_s2 + $0x40] sm:$0xff]  ;;  %v1771_v10 = vld [vmem:[%s2645_s1 + $0xfc] ss:$20 sps:$4 sm:$0xff]  }
  0x18   :  { %1534 = vmatpush3.bf16.msra.mxu0 %v1720_v23  ;;  %174 = vperm.xlu1 %1697, %v144_v54   ;;  %v150_v3 = vld [vmem:[%s2646_s2 + $0x48] sm:$0xff]  ;;  %v1768_v7 = vld [vmem:[%s2645_s1 + $0xd0] ss:$20 sps:$4 sm:$0xff]   ;;  %v156_v14 = vld [vmem:[%s2646_s2 + $0x78] sm:$0xff] }
  0x19   :  { %1598 = vmatpush3.bf16.msra.mxu1 %v1721_v24  ;;  %1535 = vmatprep.subr.bf16.mxu0 %v1722_v25  ;;  %v1767_v5 = vld [vmem:[%s2645_s1 + $0xc8] ss:$20 sps:$4 sm:$0xff]   ;;  %v151_v9 = vld [vmem:[%s2646_s2 + $0x50] sm:$0xff]  ;;  %v153_v12 = vld [vmem:[%s2646_s2 + $0x60] sm:$0xff] }
  0x1a   :  { %1599 = vmatprep.subr.bf16.mxu1 %v1723_v26  ;;  %179 = vperm.xlu0 %1696, %v145_v60   ;;  %v1769_v8 = vld [vmem:[%s2645_s1 + $0xf4] ss:$20 sps:$4 sm:$0xff]   ;;  %v1773_v13 = vld [vmem:[%s2645_s1 + $0xf0] ss:$20 sps:$4 sm:$0xff]   ;;  %v1774_v15 = vld [vmem:[%s2645_s1 + $0xf8] ss:$20 sps:$4 sm:$0xff]  }
  0x1b   :  { %v154_v11 = vld [vmem:[%s2646_s2 + $0x68] sm:$0xff]  ;;  %v1776_v16 = vld [vmem:[%s2645_s1 + $0x11c] ss:$20 sps:$4 sm:$0xff]   ;;  %v1778_v18 = vld [vmem:[%s2645_s1 + $0x124] ss:$20 sps:$4 sm:$0xff]  }
  0x1c   :  { %1536 = vmatpush3.bf16.msra.mxu0 %v1724_v27  ;;  %184 = vperm.xlu1 %1697, %v146_v59   ;;  %v155_v17 = vld [vmem:[%s2646_s2 + $0x70] sm:$0xff]  ;;  %v1195_v19 = vld [vmem:[%s2647_s3] sm:$0xff]  ;;  %v1196_v20 = vld [vmem:[%s2647_s3 + $0x8] sm:$0xff] }
  0x1d   :  { %1600 = vmatpush3.bf16.msra.mxu1 %v1725_v28  ;;  %1537 = vmatprep.subr.bf16.mxu0 %v1726_v29  ;;  %v1780_v21 = vld [vmem:[%s2645_s1 + $0x118] ss:$20 sps:$4 sm:$0xff]   ;;  %v1197_v22 = vld [vmem:[%s2647_s3 + $0x10] sm:$0xff]  ;;  %v1199_v25 = vld [vmem:[%s2647_s3 + $0x20] sm:$0xff] }
  0x1e   :  { %1601 = vmatprep.subr.bf16.mxu1 %v1727_v30  ;;  %189 = vperm.xlu0 %1696, %v147_v1   ;;  %v1781_v23 = vld [vmem:[%s2645_s1 + $0x120] ss:$20 sps:$4 sm:$0xff]   ;;  %v1782_v24 = vld [vmem:[%s2645_s1 + $0x10] ss:$20 sps:$4 sm:$0xff]   ;;  %v1198_v27 = vld [vmem:[%s2647_s3 + $0x18] sm:$0xff] }
  0x1f   :  { %v1783_v26 = vld [vmem:[%s2645_s1 + $0xb0] ss:$20 sps:$4 sm:$0xff]   ;;  %v1784_v29 = vld [vmem:[%s2645_s1 + $0x38] ss:$20 sps:$4 sm:$0xff]   ;;  %v1787_v34 = vld [vmem:[%s2645_s1 + $0x100] ss:$20 sps:$4 sm:$0xff]  }
  0x20   :  { %1538 = vmatpush3.bf16.msra.mxu0 %v1728_v31  ;;  %194 = vperm.xlu1 %1697, %v148_v0   ;;  %v1201_v28 = vld [vmem:[%s2647_s3 + $0x30] sm:$0xff]  ;;  %v1200_v30 = vld [vmem:[%s2647_s3 + $0x28] sm:$0xff]  ;;  %v1314_v53 = vld [vmem:[%s2648_s4 + $0x38] sm:$0xff] }
  0x21   :  { %1602 = vmatpush3.bf16.msra.mxu1 %v1729_v32  ;;  %1663 = vmatprep.subr.bf16.mxu0 %v1736_v37  ;;  %v1785_v31 = vld [vmem:[%s2645_s1 + $0xd8] ss:$20 sps:$4 sm:$0xff]   ;;  %v1786_v32 = vld [vmem:[%s2645_s1 + $0x60] ss:$20 sps:$4 sm:$0xff]  }
  0x22   :  { %1687 = vmatprep.subr.bf16.mxu1 %v1736_v37  ;;  %199 = vperm.xlu0 %1696, %v149_v4   ;;  %v1205_v36 = vld [vmem:[%s2647_s3 + $0x50] sm:$0xff]  ;;  %v1312_v51 = vld [vmem:[%s2648_s4 + $0x28] sm:$0xff] }
  0x23   :  { %711 = vmatmul.mubr.bf16.vlgmr.msra.gmra.mrb[0].mxu0 %v1730_v33  ;;  %v1203_v33 = vld [vmem:[%s2647_s3 + $0x40] sm:$0xff]  ;;  %v1317_v54 = vld [vmem:[%s2648_s4 + $0x50] sm:$0xff] }
  0x24   :  { %808 = vmatmul.mubr.bf16.vlgmr.msra.gmra.mrb[0].mxu1 %v1733_v35  ;;  %1664 = vmatpush3.bf16.msra.mxu0 %v1736_v37  ;;  %v1202_v35 = vld [vmem:[%s2647_s3 + $0x38] sm:$0xff] }
  0x25   :  { %718 = vmatprep.mubr.bf16.mxu0 %v1737_v38  ;;  %815 = vmatprep.mubr.bf16.mxu1 %v1739_v39  ;;  %v1204_v38 = vld [vmem:[%s2647_s3 + $0x48] sm:$0xff] }
  0x26   :  { %1691 = vmatpush3.bf16.msra.mxu1 %v1736_v37  ;;  %1665 = vmatprep.subr.bf16.mxu0 %v1749_v43  ;;  %v1788_v37 = vld [vmem:[%s2645_s1 + $0x88] ss:$20 sps:$4 sm:$0xff]  }
  0x27   :  { %1688 = vmatprep.subr.bf16.mxu1 %v1749_v43  ;;  %204 = vperm.xlu1 %1697, %v150_v3   ;;  %v1789_v39 = vld [vmem:[%s2645_s1 + $0x128] ss:$20 sps:$4 sm:$0xff]  }
  0x28   :  { %1666 = vmatpush3.bf16.msra.mxu0 %v1749_v43  ;;  %209 = vperm.xlu0 %1696, %v151_v9  }
  0x29   :  { %1667 = vmatprep.subr.bf16.mxu0 %v1762_v47 }
  0x2a   :  { %1692 = vmatpush3.bf16.msra.mxu1 %v1749_v43  ;;  %v1208_v43 = vld [vmem:[%s2647_s3 + $0x68] sm:$0xff] }
  0x2b   :  { %719 = vmatmul.mubr.bf16.gmra.mrb[4].mxu0 %v1741_v40  ;;  %1689 = vmatprep.subr.bf16.mxu1 %v1762_v47  ;;  %v1207_v40 = vld [vmem:[%s2647_s3 + $0x60] sm:$0xff] }
  0x2c   :  { %816 = vmatmul.mubr.bf16.gmra.mrb[4].mxu1 %v1742_v41  ;;  %726 = vmatprep.mubr.bf16.mxu0 %v1743_v42  ;;  %v1206_v41 = vld [vmem:[%s2647_s3 + $0x58] sm:$0xff]  ;;  %v1209_v42 = vld [vmem:[%s2647_s3 + $0x70] sm:$0xff] }
  0x2d   :  { %823 = vmatprep.mubr.bf16.mxu1 %v1745_v44  ;;  %1668 = vmatpush3.bf16.msra.mxu0 %v1762_v47  ;;  %v1307_v44 = vld [vmem:[%s2648_s4] sm:$0xff] }
  0x2e   :  { %1693 = vmatpush3.bf16.msra.mxu1 %v1762_v47  ;;  %1669 = vmatprep.subr.bf16.mxu0 %v1775_v50  ;;  %v1308_v47 = vld [vmem:[%s2648_s4 + $0x8] sm:$0xff] }
  0x2f   :  { %1690 = vmatprep.subr.bf16.mxu1 %v1775_v50  ;;  %214 = vperm.xlu1 %1697, %v152_v6  }
  0x30   :  { %219 = vperm.xlu0 %1696, %v153_v12  }
  0x31   :  { %1670 = vmatpush3.bf16.msra.mxu0 %v1775_v50 }
  0x32   :  { %1694 = vmatpush3.bf16.msra.mxu1 %v1775_v50  ;;  %v1313_v50 = vld [vmem:[%s2648_s4 + $0x30] sm:$0xff] }
  0x33   :  { %727 = vmatmul.mubr.bf16.gmra.mrb[8].mxu0 %v1747_v45  ;;  %224 = vperm.xlu1 %1697, %v154_v11   ;;  %v1210_v45 = vld [vmem:[%s2647_s3 + $0x78] sm:$0xff] }
  0x34   :  { %824 = vmatmul.mubr.bf16.gmra.mrb[8].mxu1 %v1748_v46  ;;  %734 = vmatprep.mubr.bf16.mxu0 %v1750_v48  ;;  %v1309_v46 = vld [vmem:[%s2648_s4 + $0x10] sm:$0xff]  ;;  %v1311_v48 = vld [vmem:[%s2648_s4 + $0x20] sm:$0xff] }
  0x35   :  { %831 = vmatprep.mubr.bf16.mxu1 %v1752_v49  ;;  %229 = vperm.xlu0 %1696, %v155_v17   ;;  %v1310_v49 = vld [vmem:[%s2648_s4 + $0x18] sm:$0xff] }
  0x37   :  { %234 = vperm.xlu1 %1697, %v156_v14  }
  0x39   :  { %1218 = vperm.xlu0 %1696, %v1196_v20  }
  0x3b   :  { %735 = vmatmul.mubr.bf16.gmra.mrb[12].mxu0 %v1754_v52  ;;  %1213 = vperm.xlu1 %1697, %v1195_v19   ;;  %v1315_v52 = vld [vmem:[%s2648_s4 + $0x40] sm:$0xff] }
  0x3c   :  { %832 = vmatmul.mubr.bf16.gmra.mrb[12].mxu1 %v1755_v55  ;;  %742 = vmatprep.mubr.bf16.mxu0 %v1756_v56  ;;  %v1316_v55 = vld [vmem:[%s2648_s4 + $0x48] sm:$0xff]  ;;  %v1318_v56 = vld [vmem:[%s2648_s4 + $0x58] sm:$0xff] }
  0x3d   :  { %839 = vmatprep.mubr.bf16.mxu1 %v1758_v57  ;;  %1233 = vperm.xlu0 %1696, %v1199_v25  }
  0x3f   :  { %1223 = vperm.xlu1 %1697, %v1197_v22  }
  0x41   :  { %1243 = vperm.xlu0 %1696, %v1201_v28  }
  0x43   :  { %743 = vmatmul.mubr.bf16.gmra.mrb[16].mxu0 %v1760_v61  ;;  %1228 = vperm.xlu1 %1697, %v1198_v27  }
  0x44   :  { %840 = vmatmul.mubr.bf16.gmra.mrb[16].mxu1 %v1761_v62  ;;  %750 = vmatprep.mubr.bf16.mxu0 %v1763_v63 }
  0x45   :  { %847 = vmatprep.mubr.bf16.mxu1 %v1765_v2  ;;  %1253 = vperm.xlu0 %1696, %v1203_v33  }
  0x47   :  { %1238 = vperm.xlu1 %1697, %v1200_v30  }
  0x49   :  { %1263 = vperm.xlu0 %1696, %v1205_v36  }
  0x4b   :  { %751 = vmatmul.mubr.bf16.gmra.mrb[20].mxu0 %v1767_v5  ;;  %1248 = vperm.xlu1 %1697, %v1202_v35  }
  0x4c   :  { %848 = vmatmul.mubr.bf16.gmra.mrb[20].mxu1 %v1768_v7  ;;  %758 = vmatprep.mubr.bf16.mxu0 %v1769_v8 }
  0x4d   :  { %855 = vmatprep.mubr.bf16.mxu1 %v1771_v10  ;;  %1273 = vperm.xlu0 %1696, %v1207_v40  }
  0x4f   :  { %1258 = vperm.xlu1 %1697, %v1204_v38  }
  0x51   :  { %1283 = vperm.xlu0 %1696, %v1209_v42  }
  0x53   :  { %759 = vmatmul.mubr.bf16.gmra.mrb[24].mxu0 %v1773_v13  ;;  %1268 = vperm.xlu1 %1697, %v1206_v41  }
  0x54   :  { %856 = vmatmul.mubr.bf16.gmra.mrb[24].mxu1 %v1774_v15  ;;  %766 = vmatprep.mubr.bf16.mxu0 %v1776_v16 }
  0x55   :  { %863 = vmatprep.mubr.bf16.mxu1 %v1778_v18  ;;  %1325 = vperm.xlu0 %1696, %v1307_v44  }
  0x57   :  { %1278 = vperm.xlu1 %1697, %v1208_v43  }
  0x59   :  { %1335 = vperm.xlu0 %1696, %v1309_v46  }
  0x5b   :  { %767 = vmatmul.mubr.bf16.gmra.mrb[28].mxu0 %v1780_v21  ;;  %1288 = vperm.xlu1 %1697, %v1210_v45  }
  0x5c   :  { %864 = vmatmul.mubr.bf16.gmra.mrb[28].mxu1 %v1781_v23  ;;  %1671 = vmatprep.mubr.msk.bf16.mxu0 %vm653_vm0, %v1782_v24 }
  0x5d   :  { %1679 = vmatprep.mubr.msk.bf16.mxu1 %vm653_vm0, %v1783_v26  ;;  %1345 = vperm.xlu0 %1696, %v1311_v48  }
  0x5f   :  { %1330 = vperm.xlu1 %1697, %v1308_v47  }
  0x61   :  { %1355 = vperm.xlu0 %1696, %v1313_v50  }
  0x63   :  { %1672 = vmatmul.mubr.msk.bf16.vlgmr.msra.gmra.mrb[32].mxu0 %vm653_vm0, %v1784_v29  ;;  %1340 = vperm.xlu1 %1697, %v1310_v49  }
  0x64   :  { %1680 = vmatmul.mubr.msk.bf16.vlgmr.msra.gmra.mrb[32].mxu1 %vm653_vm0, %v1785_v31  ;;  %1675 = vmatprep.mubr.msk.bf16.mxu0 %vm653_vm0, %v1786_v32 }
  0x65   :  { %1683 = vmatprep.mubr.msk.bf16.mxu1 %vm653_vm0, %v1787_v34  ;;  %1365 = vperm.xlu0 %1696, %v1315_v52  }
  0x67   :  { %1350 = vperm.xlu1 %1697, %v1312_v51  }
  0x69   :  { %1375 = vperm.xlu0 %1696, %v1317_v54  }
  0x6b   :  { %1676 = vmatmul.mubr.msk.bf16.gmra.mrb[36].mxu0 %vm653_vm0, %v1788_v37  ;;  %1360 = vperm.xlu1 %1697, %v1314_v53  }
  0x6c   :  { %1684 = vmatmul.mubr.msk.bf16.gmra.mrb[36].mxu1 %vm653_vm0, %v1789_v39 }
  0x6f   :  { %1370 = vperm.xlu1 %1697, %v1316_v55  }
  0x73   :  { %1380 = vperm.xlu1 %1697, %v1318_v56  }
  0x91   :  { %v160_v57 = vpop.permute.xlu0 %159 }
  0x93   :  { %v170_v10 = vpop.permute.xlu1 %169 }
  0x95   :  { %v165_v6 = vpop.permute.xlu0 %164 }
  0x97   :  { %v175_v24 = vpop.permute.xlu1 %174 }
  0x99   :  { %v180_v28 = vpop.permute.xlu0 %179 }
  0x9b   :  { %v185_v42 = vpop.permute.xlu1 %184 }
  0x9d   :  { %v190_v46 = vpop.permute.xlu0 %189 }
  0xf6   :  { %v1539_v58 = vpop.f32.mrb[0].mxu0 }
  0xf7   :  { %v1540_v59 = vpop.f32.mrb[1].mxu0  ;;  %v1603_v60 = vpop.f32.mrb[0].mxu1 }
  0xf8   :  { %v1541_v61 = vadd.f32 %v1540_v59, %v1539_v58  ;;  %v1542_v62 = vpop.f32.mrb[2].mxu0  ;;  %v1604_v63 = vpop.f32.mrb[1].mxu1 }
  0xf9   :  { %v1543_v0 = vpop.f32.mrb[3].mxu0  ;;  %v1605_v1 = vadd.f32 %v1604_v63, %v1603_v60  ;;  %v1606_v2 = vpop.f32.mrb[2].mxu1 }
  0xfa   :  { %v713_v3 = vadd.f32 %v1541_v61, %v160_v57  ;;  %v1544_v4 = vadd.f32 %v1543_v0, %v1542_v62  ;;  %v1607_v5 = vpop.f32.mrb[3].mxu1  ;;  %v195_v60 = vpop.permute.xlu1 %194 }
  0xfb   :  { %v1608_v7 = vadd.f32 %v1607_v5, %v1606_v2  ;;  %v200_v0 = vpop.permute.xlu0 %199 }
  0xfc   :  { %v716_v8 = vadd.f32 %v1544_v4, %v165_v6  ;;  %v2221_v9 = vadd.f32 %v1605_v1, %v713_v3 }
  0xfe   :  { %v1545_v11 = vpop.f32.mrb[4].mxu0  ;;  %v2223_v12 = vadd.f32 %v1608_v7, %v716_v8 }
  0xff   :  { %v1546_v13 = vpop.f32.mrb[5].mxu0  ;;  %v1609_v14 = vpop.f32.mrb[4].mxu1 }
 0x100   :  { %v1547_v15 = vadd.f32 %v1546_v13, %v1545_v11  ;;  %v1548_v16 = vpop.f32.mrb[6].mxu0  ;;  %v1610_v17 = vpop.f32.mrb[5].mxu1 }
 0x101   :  { %v1549_v18 = vpop.f32.mrb[7].mxu0  ;;  %v1611_v19 = vadd.f32 %v1610_v17, %v1609_v14  ;;  %v1612_v20 = vpop.f32.mrb[6].mxu1 }
 0x102   :  { %v721_v21 = vadd.f32 %v1547_v15, %v170_v10  ;;  %v1550_v22 = vadd.f32 %v1549_v18, %v1548_v16  ;;  %v1613_v23 = vpop.f32.mrb[7].mxu1  ;;  %v205_v16 = vpop.permute.xlu1 %204 }
 0x103   :  { %v1614_v25 = vadd.f32 %v1613_v23, %v1612_v20  ;;  %v210_v20 = vpop.permute.xlu0 %209 }
 0x104   :  { %v724_v26 = vadd.f32 %v1550_v22, %v175_v24  ;;  %v2225_v27 = vadd.f32 %v1611_v19, %v721_v21 }
 0x106   :  { %v1551_v29 = vpop.f32.mrb[8].mxu0  ;;  %v2227_v30 = vadd.f32 %v1614_v25, %v724_v26 }
 0x107   :  { %v1552_v31 = vpop.f32.mrb[9].mxu0  ;;  %v1615_v32 = vpop.f32.mrb[8].mxu1 }
 0x108   :  { %v1553_v33 = vadd.f32 %v1552_v31, %v1551_v29  ;;  %v1554_v34 = vpop.f32.mrb[10].mxu0  ;;  %v1616_v35 = vpop.f32.mrb[9].mxu1 }
 0x109   :  { %v1555_v36 = vpop.f32.mrb[11].mxu0  ;;  %v1617_v37 = vadd.f32 %v1616_v35, %v1615_v32  ;;  %v1618_v38 = vpop.f32.mrb[10].mxu1 }
 0x10a   :  { %v729_v39 = vadd.f32 %v1553_v33, %v180_v28  ;;  %v1556_v40 = vadd.f32 %v1555_v36, %v1554_v34  ;;  %v1619_v41 = vpop.f32.mrb[11].mxu1  ;;  %v215_v36 = vpop.permute.xlu1 %214 }
 0x10b   :  { %v1620_v43 = vadd.f32 %v1619_v41, %v1618_v38 }
 0x10c   :  { %v732_v44 = vadd.f32 %v1556_v40, %v185_v42  ;;  %v2229_v45 = vadd.f32 %v1617_v37, %v729_v39  ;;  %v220_v40 = vpop.permute.xlu0 %219 }
 0x10e   :  { %v1557_v47 = vpop.f32.mrb[12].mxu0  ;;  %v2231_v48 = vadd.f32 %v1620_v43, %v732_v44 }
 0x10f   :  { %v1558_v49 = vpop.f32.mrb[13].mxu0  ;;  %v1621_v50 = vpop.f32.mrb[12].mxu1 }
 0x110   :  { %v1559_v51 = vadd.f32 %v1558_v49, %v1557_v47  ;;  %v1560_v52 = vpop.f32.mrb[14].mxu0  ;;  %v1622_v53 = vpop.f32.mrb[13].mxu1 }
 0x111   :  { %v1561_v54 = vpop.f32.mrb[15].mxu0  ;;  %v1623_v55 = vadd.f32 %v1622_v53, %v1621_v50  ;;  %v1624_v56 = vpop.f32.mrb[14].mxu1 }
 0x112   :  { %v737_v57 = vadd.f32 %v1559_v51, %v190_v46  ;;  %v1562_v58 = vadd.f32 %v1561_v54, %v1560_v52  ;;  %v1625_v59 = vpop.f32.mrb[15].mxu1 }
 0x113   :  { %v1626_v61 = vadd.f32 %v1625_v59, %v1624_v56  ;;  %v225_v56 = vpop.permute.xlu1 %224 }
 0x114   :  { %v740_v62 = vadd.f32 %v1562_v58, %v195_v60  ;;  %v2233_v63 = vadd.f32 %v1623_v55, %v737_v57  ;;  %v230_v60 = vpop.permute.xlu0 %229 }
 0x116   :  { %v1563_v1 = vpop.f32.mrb[16].mxu0  ;;  %v2235_v2 = vadd.f32 %v1626_v61, %v740_v62 }
 0x117   :  { %v1564_v3 = vpop.f32.mrb[17].mxu0  ;;  %v1627_v4 = vpop.f32.mrb[16].mxu1 }
 0x118   :  { %v1565_v5 = vadd.f32 %v1564_v3, %v1563_v1  ;;  %v1566_v6 = vpop.f32.mrb[18].mxu0  ;;  %v1628_v7 = vpop.f32.mrb[17].mxu1 }
 0x119   :  { %v1567_v8 = vpop.f32.mrb[19].mxu0  ;;  %v1629_v10 = vadd.f32 %v1628_v7, %v1627_v4  ;;  %v1630_v11 = vpop.f32.mrb[18].mxu1 }
 0x11a   :  { %v745_v13 = vadd.f32 %v1565_v5, %v200_v0  ;;  %v1568_v14 = vadd.f32 %v1567_v8, %v1566_v6  ;;  %v1631_v15 = vpop.f32.mrb[19].mxu1 }
 0x11b   :  { %v1632_v17 = vadd.f32 %v1631_v15, %v1630_v11 }
 0x11c   :  { %v748_v18 = vadd.f32 %v1568_v14, %v205_v16  ;;  %v2237_v19 = vadd.f32 %v1629_v10, %v745_v13  ;;  %v235_v14 = vpop.permute.xlu1 %234 }
 0x11e   :  { %v1569_v21 = vpop.f32.mrb[20].mxu0  ;;  %v2239_v22 = vadd.f32 %v1632_v17, %v748_v18 }
 0x11f   :  { %v1570_v23 = vpop.f32.mrb[21].mxu0  ;;  %v1633_v24 = vpop.f32.mrb[20].mxu1 }
 0x120   :  { %v1571_v25 = vadd.f32 %v1570_v23, %v1569_v21  ;;  %v1572_v26 = vpop.f32.mrb[22].mxu0  ;;  %v1634_v28 = vpop.f32.mrb[21].mxu1 }
 0x121   :  { %v1573_v29 = vpop.f32.mrb[23].mxu0  ;;  %v1635_v31 = vadd.f32 %v1634_v28, %v1633_v24  ;;  %v1636_v32 = vpop.f32.mrb[22].mxu1 }
 0x122   :  { %v753_v33 = vadd.f32 %v1571_v25, %v210_v20  ;;  %v1574_v34 = vadd.f32 %v1573_v29, %v1572_v26  ;;  %v1637_v35 = vpop.f32.mrb[23].mxu1 }
 0x123   :  { %v1638_v37 = vadd.f32 %v1637_v35, %v1636_v32 }
 0x124   :  { %v756_v38 = vadd.f32 %v1574_v34, %v215_v36  ;;  %v850_v39 = vadd.f32 %v1635_v31, %v753_v33 }
 0x126   :  { %v1575_v41 = vpop.f32.mrb[24].mxu0  ;;  %v853_v42 = vadd.f32 %v1638_v37, %v756_v38 }
 0x127   :  { %v1576_v43 = vpop.f32.mrb[25].mxu0  ;;  %v1639_v44 = vpop.f32.mrb[24].mxu1 }
 0x128   :  { %v1577_v46 = vadd.f32 %v1576_v43, %v1575_v41  ;;  %v1578_v47 = vpop.f32.mrb[26].mxu0  ;;  %v1640_v49 = vpop.f32.mrb[25].mxu1 }
 0x129   :  { %v1579_v50 = vpop.f32.mrb[27].mxu0  ;;  %v1641_v51 = vadd.f32 %v1640_v49, %v1639_v44  ;;  %v1642_v52 = vpop.f32.mrb[26].mxu1 }
 0x12a   :  { %v761_v53 = vadd.f32 %v1577_v46, %v220_v40  ;;  %v1580_v54 = vadd.f32 %v1579_v50, %v1578_v47  ;;  %v1643_v55 = vpop.f32.mrb[27].mxu1 }
 0x12b   :  { %v1644_v57 = vadd.f32 %v1643_v55, %v1642_v52 }
 0x12c   :  { %v764_v58 = vadd.f32 %v1580_v54, %v225_v56  ;;  %v858_v59 = vadd.f32 %v1641_v51, %v761_v53 }
 0x12e   :  { %v1581_v61 = vpop.f32.mrb[28].mxu0  ;;  %v2241_v62 = vadd.f32 %v1644_v57, %v764_v58 }
 0x12f   :  { %v1582_v0 = vpop.f32.mrb[29].mxu0  ;;  %v1645_v1 = vpop.f32.mrb[28].mxu1 }
 0x130   :  { %v1583_v3 = vadd.f32 %v1582_v0, %v1581_v61  ;;  %v1584_v4 = vpop.f32.mrb[30].mxu0  ;;  %v1646_v5 = vpop.f32.mrb[29].mxu1 }
 0x131   :  { %v1585_v6 = vpop.f32.mrb[31].mxu0  ;;  %v1647_v7 = vadd.f32 %v1646_v5, %v1645_v1  ;;  %v1648_v8 = vpop.f32.mrb[30].mxu1 }
 0x132   :  { %v769_v10 = vadd.f32 %v1583_v3, %v230_v60  ;;  %v1586_v11 = vadd.f32 %v1585_v6, %v1584_v4  ;;  %v1649_v13 = vpop.f32.mrb[31].mxu1 }
 0x133   :  { %v1650_v15 = vadd.f32 %v1649_v13, %v1648_v8 }
 0x134   :  { %v772_v16 = vadd.f32 %v1586_v11, %v235_v14  ;;  %v866_v17 = vadd.f32 %v1647_v7, %v769_v10 }
 0x136   :  { %v1673_v18 = vpop.f32.mrb[32].mxu0  ;;  %v869_v20 = vadd.f32 %v1650_v15, %v772_v16 }
 0x137   :  { %v2244_v21 = vadd.f32 %v1673_v18, %v2225_v27  ;;  %v1681_v23 = vpop.f32.mrb[32].mxu1  ;;  %v906_v24 = vpop.f32.mrb[33].mxu0 }
 0x138   :  { %v2246_v25 = vadd.f32 %v1681_v23, %v850_v39  ;;  %v2249_v26 = vadd.f32 %v906_v24, %v2221_v9  ;;  %v938_v28 = vpop.f32.mrb[33].mxu1  ;;  %v1674_v29 = vpop.f32.mrb[34].mxu0  ;;  %v1319_v23 = vld [vmem:[%s2648_s4 + $0x60] sm:$0xff] }
 0x139   :  { %v971_v31 = vmax.f32 %v2244_v21, 0.0  ;;  %v2253_v32 = vadd.f32 %v938_v28, %v2237_v19  ;;  %v2256_v33 = vadd.f32 %v1674_v29, %v2227_v30  ;;  %v1682_v27 = vpop.f32.mrb[34].mxu1  ;;  %v909_v34 = vpop.f32.mrb[35].mxu0 }
 0x13a   :  { %v979_v35 = vmax.f32 %v2246_v25, 0.0  ;;  %v2259_v36 = vadd.f32 %v1682_v27, %v853_v42  ;;  %v2262_v9 = vadd.f32 %v909_v34, %v2223_v12  ;;  %v941_v37 = vpop.f32.mrb[35].mxu1  ;;  %v969_v38 = vmax.f32 %v2249_v26, 0.0  ;;  %v2356_v24 = vpop.permute.xlu1 %1213 }
 0x13b   :  { %v2266_v39 = vadd.f32 %v941_v37, %v2239_v22  ;;  %v992_v30 = vsel %vm985_vm1, %v971_v31, 0.0  ;;  %v977_v19 = vmax.f32 %v2253_v32, 0.0  ;;  %v972_v41 = vmax.f32 %v2256_v33, 0.0  ;;  %v2360_v29 = vpop.permute.xlu0 %1218 }
 0x13c   :  { %v1016_v40 = vsel %vm985_vm1, %v979_v35, 0.0  ;;  %993 = vadd.xlane.f32.xlu0 %v992_v30  ;;  %v986_v44 = vsel %vm985_vm1, %v969_v38, 0.0  ;;  %v970_v46 = vmax.f32 %v2262_v9, 0.0  ;;  %v980_v58 = vmax.f32 %v2259_v36, 0.0 }
 0x13d   :  { %1017 = vadd.xlane.f32.xlu1 %v1016_v40 }
 0x13e   :  { %v1677_v12 = vpop.f32.mrb[36].mxu0  ;;  %v989_v61 = vsel %vm985_vm1, %v970_v46, 0.0  ;;  %v1019_v0 = vsel %vm985_vm1, %v980_v58, 0.0  ;;  %v2358_v28 = vpop.permute.xlu1 %1223 }
 0x13f   :  { %v2277_v42 = vadd.f32 %v1677_v12, %v2233_v63  ;;  %v1685_v22 = vpop.f32.mrb[36].mxu1  ;;  %v922_v43 = vpop.f32.mrb[37].mxu0  ;;  %v1010_v63 = vsel %vm985_vm1, %v977_v19, 0.0 }
 0x140   :  { %v2283_v47 = vadd.f32 %v1685_v22, %v866_v17  ;;  %v2286_v49 = vadd.f32 %v922_v43, %v2229_v45  ;;  %v954_v50 = vpop.f32.mrb[37].mxu1  ;;  %v1678_v51 = vpop.f32.mrb[38].mxu0  ;;  %987 = vadd.xlane.f32.xlu0 %v986_v44 }
 0x141   :  { %v2291_v52 = vadd.f32 %v954_v50, %v858_v59  ;;  %v2294_v53 = vadd.f32 %v1678_v51, %v2235_v2  ;;  %v1686_v54 = vpop.f32.mrb[38].mxu1  ;;  %1011 = vadd.xlane.f32.xlu1 %v1010_v63  ;;  %v925_v55 = vpop.f32.mrb[39].mxu0  ;;  %v995_v59 = vsel %vm985_vm1, %v972_v41, 0.0  ;;  %v975_v2 = vmax.f32 %v2277_v42, 0.0 }
 0x142   :  { %v2296_v56 = vadd.f32 %v1686_v54, %v869_v20  ;;  %v2299_v45 = vadd.f32 %v925_v55, %v2231_v48  ;;  %v957_v57 = vpop.f32.mrb[39].mxu1  ;;  %v2657_v48 = vmax.f32 %v2266_v39, 0.0  ;;  %v2654_v5 = vmax.f32 %v2286_v49, 0.0  ;;  %v1320_v20 = vld [vmem:[%s2648_s4 + $0x68] sm:$0xff]  ;;  %v2362_v27 = vpop.permute.xlu1 %1228 }
 0x143   :  { %v2303_v60 = vadd.f32 %v957_v57, %v2241_v62  ;;  %v2656_v62 = vmax.f32 %v2283_v47, 0.0  ;;  %v1004_v1 = vsel %vm985_vm1, %v975_v2, 0.0  ;;  %v2655_v3 = vmax.f32 %v2294_v53, 0.0  ;;  %v2364_v34 = vpop.permute.xlu0 %1233 }
 0x144   :  { %996 = vadd.xlane.f32.xlu0 %v995_v59  ;;  %v1013_v4 = vsel %vm985_vm1, %v2657_v48, 0.0  ;;  %v2653_v7 = vmax.f32 %v2296_v56, 0.0  ;;  %v2652_v10 = vmax.f32 %v2291_v52, 0.0  ;;  %v998_v11 = vsel %vm985_vm1, %v2654_v5, 0.0 }
 0x145   :  { %990 = vadd.xlane.f32.xlu1 %v989_v61  ;;  %v1028_v6 = vsel %vm985_vm1, %v2656_v62, 0.0  ;;  %v1007_v8 = vsel %vm985_vm1, %v2655_v3, 0.0  ;;  %v2651_v13 = vmax.f32 %v2299_v45, 0.0  ;;  %v2650_v16 = vmax.f32 %v2303_v60, 0.0 }
 0x146   :  { %v1031_v14 = vsel %vm985_vm1, %v2653_v7, 0.0  ;;  %v1022_v15 = vsel %vm985_vm1, %v2652_v10, 0.0  ;;  %v2366_v37 = vpop.permute.xlu1 %1238 }
 0x147   :  { %v1001_v17 = vsel %vm985_vm1, %v2651_v13, 0.0  ;;  %v1025_v18 = vsel %vm985_vm1, %v2650_v16, 0.0  ;;  %v2368_v30 = vpop.permute.xlu0 %1243 }
 0x148   :  { %1020 = vadd.xlane.f32.xlu0 %v1019_v0 }
 0x149   :  { %1005 = vadd.xlane.f32.xlu1 %v1004_v1 }
 0x14a   :  { %v2370_v40 = vpop.permute.xlu1 %1248 }
 0x14b   :  { %v2372_v12 = vpop.permute.xlu0 %1253 }
 0x14c   :  { %1014 = vadd.xlane.f32.xlu0 %v1013_v4 }
 0x14d   :  { %1029 = vadd.xlane.f32.xlu1 %v1028_v6 }
 0x14e   :  { %v2374_v22 = vpop.permute.xlu1 %1258 }
 0x14f   :  { %v2376_v43 = vpop.permute.xlu0 %1263 }
 0x150   :  { %1008 = vadd.xlane.f32.xlu0 %v1007_v8 }
 0x151   :  { %999 = vadd.xlane.f32.xlu1 %v998_v11 }
 0x152   :  { %v2378_v44 = vpop.permute.xlu1 %1268 }
 0x153   :  { %v2380_v50 = vpop.permute.xlu0 %1273 }
 0x154   :  { %1032 = vadd.xlane.f32.xlu0 %v1031_v14 }
 0x155   :  { %1023 = vadd.xlane.f32.xlu1 %v1022_v15 }
 0x156   :  { %v2382_v51 = vpop.permute.xlu1 %1278 }
 0x157   :  { %v2384_v63 = vpop.permute.xlu0 %1283 }
 0x158   :  { %1002 = vadd.xlane.f32.xlu0 %v1001_v17 }
 0x15a   :  { %v2386_v54 = vpop.permute.xlu1 %1288 }
 0x15b   :  { %v2388_v55 = vpop.permute.xlu0 %1325 }
 0x15c   :  { %1026 = vadd.xlane.f32.xlu0 %v1025_v18 }
 0x15e   :  { %v2390_v57 = vpop.permute.xlu1 %1330 }
 0x15f   :  { %v2392_v59 = vpop.permute.xlu0 %1335 }
 0x162   :  { %v2394_v61 = vpop.permute.xlu1 %1340 }
 0x163   :  { %v2396_v0 = vpop.permute.xlu0 %1345 }
 0x166   :  { %1390 = vperm.xlu1 %1697, %v1320_v20   ;;  %v2398_v1 = vpop.permute.xlu1 %1350 }
 0x167   :  { %v2400_v4 = vpop.permute.xlu0 %1355 }
 0x16a   :  { %v2402_v6 = vpop.permute.xlu1 %1360 }
 0x16b   :  { %v2404_v8 = vpop.permute.xlu0 %1365 }
 0x16e   :  { %v2406_v11 = vpop.permute.xlu1 %1370 }
 0x16f   :  { %v2408_v14 = vpop.permute.xlu0 %1375 }
 0x172   :  { %1385 = vperm.xlu0 %1696, %v1319_v23   ;;  %v2410_v15 = vpop.permute.xlu1 %1380 }
 0x1c9   :  { %v994_v17 = vpop.xlane.xlu0 %993 }
 0x1ca   :  { %v1018_v18 = vpop.xlane.xlu1 %1017  ;;  %v1037_v20 = vmul.f32 0.03125, %v994_v17 }
 0x1cb   :  { %v1045_v23 = vmul.f32 0.03125, %v1018_v18 }
 0x1cc   :  { %v2414_v16 = vsub.f32 %v971_v31, %v1037_v20 }
 0x1cd   :  { %v2418_v13 = vsub.f32 %v979_v35, %v1045_v23  ;;  %v988_v10 = vpop.xlane.xlu0 %987 }
 0x1ce   :  { %v1012_v7 = vpop.xlane.xlu1 %1011  ;;  %v1035_v5 = vmul.f32 0.03125, %v988_v10  ;;  %v1069_v3 = vmul.f32 %v2414_v16, %v2414_v16 }
 0x1cf   :  { %v1043_v62 = vmul.f32 0.03125, %v1012_v7  ;;  %v1077_v21 = vmul.f32 %v2418_v13, %v2418_v13 }
 0x1d0   :  { %v2424_v48 = vsub.f32 %v969_v38, %v1035_v5  ;;  %v1089_v17 = vsel %vm985_vm1, %v1069_v3, 0.0 }
 0x1d1   :  { %1090 = vadd.xlane.f32.xlu1 %v1089_v17  ;;  %v997_v25 = vpop.xlane.xlu0 %996  ;;  %v2431_v10 = vsub.f32 %v977_v19, %v1043_v62  ;;  %v1113_v26 = vsel %vm985_vm1, %v1077_v21, 0.0 }
 0x1d2   :  { %v991_v31 = vpop.xlane.xlu1 %990  ;;  %v1038_v35 = vmul.f32 0.03125, %v997_v25  ;;  %v1067_v38 = vmul.f32 %v2424_v48, %v2424_v48 }
 0x1d3   :  { %v1036_v18 = vmul.f32 0.03125, %v991_v31  ;;  %v1075_v17 = vmul.f32 %v2431_v10, %v2431_v10 }
 0x1d4   :  { %v2435_v7 = vsub.f32 %v972_v41, %v1038_v35  ;;  %v1083_v41 = vsel %vm985_vm1, %v1067_v38, 0.0  ;;  %v2658_v35 = vmax.f32 %v2266_v39, 0.0  ;;  %v2659_v38 = vmax.f32 %v2283_v47, 0.0 }
 0x1d5   :  { %1114 = vadd.xlane.f32.xlu1 %v1113_v26  ;;  %v1021_v3 = vpop.xlane.xlu0 %1020  ;;  %v2444_v32 = vsub.f32 %v970_v46, %v1036_v18  ;;  %v1107_v42 = vsel %vm985_vm1, %v1075_v17, 0.0 }
 0x1d6   :  { %v1006_v5 = vpop.xlane.xlu1 %1005  ;;  %v1046_v20 = vmul.f32 0.03125, %v1021_v3  ;;  %v1070_v23 = vmul.f32 %v2435_v7, %v2435_v7 }
 0x1d7   :  { %v1041_v19 = vmul.f32 0.03125, %v1006_v5  ;;  %v1068_v31 = vmul.f32 %v2444_v32, %v2444_v32 }
 0x1d8   :  { %v2448_v33 = vsub.f32 %v980_v58, %v1046_v20  ;;  %v1092_v62 = vsel %vm985_vm1, %v1070_v23, 0.0 }
 0x1d9   :  { %v2456_v21 = vsub.f32 %v975_v2, %v1041_v19  ;;  %1084 = vadd.xlane.f32.xlu1 %v1083_v41  ;;  %1093 = vadd.xlane.f32.xlu0 %v1092_v62  ;;  %v1015_v9 = vpop.xlane.xlu0 %1014  ;;  %v1086_v39 = vsel %vm985_vm1, %v1068_v31, 0.0  ;;  %v2660_v41 = vmax.f32 %v2294_v53, 0.0 }
 0x1da   :  { %v1030_v46 = vpop.xlane.xlu1 %1029  ;;  %v1044_v25 = vmul.f32 0.03125, %v1015_v9  ;;  %v1078_v36 = vmul.f32 %v2448_v33, %v2448_v33 }
 0x1db   :  { %v1049_v58 = vmul.f32 0.03125, %v1030_v46  ;;  %v1073_v26 = vmul.f32 %v2456_v21, %v2456_v21  ;;  %v2661_v46 = vmax.f32 %v2286_v49, 0.0 }
 0x1dc   :  { %v2464_v18 = vsub.f32 %v2658_v35, %v1044_v25  ;;  %v1116_v2 = vsel %vm985_vm1, %v1078_v36, 0.0 }
 0x1dd   :  { %v2472_v3 = vsub.f32 %v2659_v38, %v1049_v58  ;;  %1108 = vadd.xlane.f32.xlu1 %v1107_v42  ;;  %1117 = vadd.xlane.f32.xlu0 %v1116_v2  ;;  %v1009_v5 = vpop.xlane.xlu0 %1008  ;;  %v1101_v17 = vsel %vm985_vm1, %v1073_v26, 0.0  ;;  %v2662_v42 = vmax.f32 %v2296_v56, 0.0  ;;  %v2664_v56 = vmax.f32 %v2299_v45, 0.0 }
 0x1de   :  { %v1000_v20 = vpop.xlane.xlu1 %999  ;;  %v1042_v23 = vmul.f32 0.03125, %v1009_v5  ;;  %v1076_v47 = vmul.f32 %v2464_v18, %v2464_v18  ;;  %v2663_v5 = vmax.f32 %v2291_v52, 0.0 }
 0x1df   :  { %v1039_v19 = vmul.f32 0.03125, %v1000_v20  ;;  %v1081_v9 = vmul.f32 %v2472_v3, %v2472_v3 }
 0x1e0   :  { %v2477_v62 = vsub.f32 %v2660_v41, %v1042_v23  ;;  %v1110_v38 = vsel %vm985_vm1, %v1076_v47, 0.0 }
 0x1e1   :  { %v2486_v25 = vsub.f32 %v2661_v46, %v1039_v19  ;;  %1102 = vadd.xlane.f32.xlu1 %v1101_v17  ;;  %1087 = vadd.xlane.f32.xlu0 %v1086_v39  ;;  %v1033_v36 = vpop.xlane.xlu0 %1032  ;;  %v1125_v26 = vsel %vm985_vm1, %v1081_v9, 0.0 }
 0x1e2   :  { %v1024_v58 = vpop.xlane.xlu1 %1023  ;;  %v1050_v31 = vmul.f32 0.03125, %v1033_v36  ;;  %v1074_v35 = vmul.f32 %v2477_v62, %v2477_v62  ;;  %v2665_v36 = vmax.f32 %v2303_v60, 0.0  ;;  %v1322_v60 = vld [vmem:[%s2648_s4 + $0x78] sm:$0xff] }
 0x1e3   :  { %v1047_v53 = vmul.f32 0.03125, %v1024_v58  ;;  %v1071_v49 = vmul.f32 %v2486_v25, %v2486_v25 }
 0x1e4   :  { %v2492_v2 = vsub.f32 %v2662_v42, %v1050_v31  ;;  %v1104_v39 = vsel %vm985_vm1, %v1074_v35, 0.0 }
 0x1e5   :  { %v2500_v20 = vsub.f32 %v2663_v5, %v1047_v53  ;;  %1126 = vadd.xlane.f32.xlu1 %v1125_v26  ;;  %1111 = vadd.xlane.f32.xlu0 %v1110_v38  ;;  %v1003_v23 = vpop.xlane.xlu0 %1002  ;;  %v1095_v17 = vsel %vm985_vm1, %v1071_v49, 0.0  ;;  %v1321_v38 = vld [vmem:[%s2648_s4 + $0x70] sm:$0xff] }
 0x1e6   :  { %v1040_v19 = vmul.f32 0.03125, %v1003_v23  ;;  %v1082_v52 = vmul.f32 %v2492_v2, %v2492_v2  ;;  %v2530_v49 = vpop.permute.xlu1 %1390 }
 0x1e7   :  { %v1079_v9 = vmul.f32 %v2500_v20, %v2500_v20 }
 0x1e8   :  { %v2505_v41 = vsub.f32 %v2664_v56, %v1040_v19  ;;  %v1128_v31 = vsel %vm985_vm1, %v1082_v52, 0.0 }
 0x1e9   :  { %1096 = vadd.xlane.f32.xlu1 %v1095_v17  ;;  %1105 = vadd.xlane.f32.xlu0 %v1104_v39  ;;  %v1027_v47 = vpop.xlane.xlu0 %1026  ;;  %v1119_v45 = vsel %vm985_vm1, %v1079_v9, 0.0 }
 0x1ea   :  { %v1048_v46 = vmul.f32 0.03125, %v1027_v47  ;;  %v1072_v53 = vmul.f32 %v2505_v41, %v2505_v41 }
 0x1ec   :  { %v2514_v58 = vsub.f32 %v2665_v36, %v1048_v46  ;;  %v1098_v35 = vsel %vm985_vm1, %v1072_v53, 0.0 }
 0x1ed   :  { %1120 = vadd.xlane.f32.xlu1 %v1119_v45  ;;  %1129 = vadd.xlane.f32.xlu0 %v1128_v31 }
 0x1ee   :  { %v1080_v42 = vmul.f32 %v2514_v58, %v2514_v58 }
 0x1f0   :  { %v1122_v26 = vsel %vm985_vm1, %v1080_v42, 0.0 }
 0x1f1   :  { %1099 = vadd.xlane.f32.xlu0 %v1098_v35  ;;  %v2532_v39 = vpop.permute.xlu0 %1385 }
 0x1f5   :  { %1123 = vadd.xlane.f32.xlu0 %v1122_v26 }
 0x1fe   :  { %1400 = vperm.xlu1 %1697, %v1322_v60  }
 0x20b   :  { %1395 = vperm.xlu0 %1696, %v1321_v38  }
 0x25e   :  { %v1091_v5 = vpop.xlane.xlu1 %1090 }
 0x25f   :  { %v1133_v23 = vmul.f32 0.03125, %v1091_v5 }
 0x261   :  { %v1149_v19 = vadd.f32 1e-05, %v1133_v23 }
 0x262   :  { %v1115_v56 = vpop.xlane.xlu1 %1114 }
 0x263   :  { %1790 = vrsqrt.f32 %v1149_v19  ;;  %v1141_v17 = vmul.f32 0.03125, %v1115_v56 }
 0x265   :  { %v1157_v9 = vadd.f32 1e-05, %v1141_v17 }
 0x266   :  { %v1085_v52 = vpop.xlane.xlu1 %1084  ;;  %v1094_v47 = vpop.xlane.xlu0 %1093 }
 0x267   :  { %1792 = vrsqrt.f32 %v1157_v9  ;;  %v1131_v46 = vmul.f32 0.03125, %v1085_v52  ;;  %v1134_v36 = vmul.f32 0.03125, %v1094_v47 }
 0x269   :  { %v1147_v45 = vadd.f32 1e-05, %v1131_v46  ;;  %v1150_v31 = vadd.f32 1e-05, %v1134_v36 }
 0x26a   :  { %v1109_v53 = vpop.xlane.xlu1 %1108  ;;  %v1118_v35 = vpop.xlane.xlu0 %1117 }
 0x26b   :  { %1794 = vrsqrt.f32 %v1147_v45  ;;  %v1139_v42 = vmul.f32 0.03125, %v1109_v53  ;;  %v1142_v26 = vmul.f32 0.03125, %v1118_v35 }
 0x26c   :  { %1796 = vrsqrt.f32 %v1150_v31 }
 0x26d   :  { %v1791_v60 = vpop.eup %1790  ;;  %v1155_v38 = vadd.f32 1e-05, %v1139_v42  ;;  %v1158_v5 = vadd.f32 1e-05, %v1142_v26 }
 0x26e   :  { %v1181_v23 = vmul.f32 %v1791_v60, %v2414_v16  ;;  %v1103_v19 = vpop.xlane.xlu1 %1102  ;;  %v1088_v56 = vpop.xlane.xlu0 %1087 }
 0x26f   :  { %1798 = vrsqrt.f32 %v1155_v38  ;;  %v1137_v17 = vmul.f32 0.03125, %v1103_v19  ;;  %v1132_v9 = vmul.f32 0.03125, %v1088_v56 }
 0x270   :  { %v1293_v52 = vmul.f32 %v2358_v28, %v1181_v23  ;;  %1800 = vrsqrt.f32 %v1158_v5 }
 0x271   :  { %v1793_v47 = vpop.eup %1792  ;;  %v1153_v46 = vadd.f32 1e-05, %v1137_v17  ;;  %v1148_v36 = vadd.f32 1e-05, %v1132_v9 }
 0x272   :  { %v1405_v45 = vadd.f32 %v2392_v59, %v1293_v52  ;;  %v1189_v31 = vmul.f32 %v1793_v47, %v2418_v13  ;;  %v1127_v53 = vpop.xlane.xlu1 %1126  ;;  %v1112_v35 = vpop.xlane.xlu0 %1111 }
 0x273   :  { %1802 = vrsqrt.f32 %v1153_v46  ;;  %v1145_v42 = vmul.f32 0.03125, %v1127_v53  ;;  %v1140_v16 = vmul.f32 0.03125, %v1112_v35 }
 0x274   :  { %1421 = vst.msk [vmem:[%s2649_s5 + $0x10] sm:$0xff] %vm985_vm1, %v1405_v45  ;;  %v1301_v28 = vmul.f32 %v2376_v43, %v1189_v31  ;;  %1804 = vrsqrt.f32 %v1148_v36 }
 0x275   :  { %v1795_v26 = vpop.eup %1794  ;;  %v1161_v60 = vadd.f32 1e-05, %v1145_v42  ;;  %v1156_v38 = vadd.f32 1e-05, %v1140_v16 }
 0x276   :  { %v1797_v5 = vpop.eup %1796  ;;  %v1413_v59 = vadd.f32 %v2408_v14, %v1301_v28  ;;  %v1179_v13 = vmul.f32 %v1795_v26, %v2424_v48  ;;  %v1097_v23 = vpop.xlane.xlu1 %1096 }
 0x277   :  { %v1106_v19 = vpop.xlane.xlu0 %1105  ;;  %v1182_v56 = vmul.f32 %v1797_v5, %v2435_v7  ;;  %1806 = vrsqrt.f32 %v1161_v60  ;;  %v1135_v17 = vmul.f32 0.03125, %v1097_v23 }
 0x278   :  { %v1138_v9 = vmul.f32 0.03125, %v1106_v19  ;;  %1429 = vst.msk [vmem:[%s2649_s5 + $0x50] sm:$0xff] %vm985_vm1, %v1413_v59  ;;  %v1291_v43 = vmul.f32 %v2356_v24, %v1179_v13  ;;  %1808 = vrsqrt.f32 %v1156_v38 }
 0x279   :  { %v1799_v52 = vpop.eup %1798  ;;  %v1294_v14 = vmul.f32 %v2362_v27, %v1182_v56  ;;  %v1151_v47 = vadd.f32 1e-05, %v1135_v17 }
 0x27a   :  { %v1154_v48 = vadd.f32 1e-05, %v1138_v9  ;;  %v1801_v46 = vpop.eup %1800  ;;  %v1403_v36 = vadd.f32 %v2388_v55, %v1291_v43  ;;  %v1187_v7 = vmul.f32 %v1799_v52, %v2431_v10  ;;  %v1121_v45 = vpop.xlane.xlu1 %1120 }
 0x27b   :  { %v1130_v31 = vpop.xlane.xlu0 %1129  ;;  %v1406_v53 = vadd.f32 %v2394_v61, %v1294_v14  ;;  %v1190_v35 = vmul.f32 %v1801_v46, %v2448_v33  ;;  %1810 = vrsqrt.f32 %v1151_v47  ;;  %v1143_v42 = vmul.f32 0.03125, %v1121_v45 }
 0x27c   :  { %1419 = vst.msk [vmem:[%s2649_s5] sm:$0xff] %vm985_vm1, %v1403_v36  ;;  %v1299_v24 = vmul.f32 %v2372_v12, %v1187_v7  ;;  %1812 = vrsqrt.f32 %v1154_v48  ;;  %v1146_v27 = vmul.f32 0.03125, %v1130_v31 }
 0x27d   :  { %v1803_v55 = vpop.eup %1802  ;;  %1422 = vst.msk [vmem:[%s2649_s5 + $0x18] sm:$0xff] %vm985_vm1, %v1406_v53  ;;  %v1302_v61 = vmul.f32 %v2378_v44, %v1190_v35  ;;  %v1159_v10 = vadd.f32 1e-05, %v1143_v42 }
 0x27e   :  { %v1805_v33 = vpop.eup %1804  ;;  %v1411_v16 = vadd.f32 %v2404_v8, %v1299_v24  ;;  %v1185_v28 = vmul.f32 %v1803_v55, %v2456_v21  ;;  %v1162_v26 = vadd.f32 1e-05, %v1146_v27 }
 0x27f   :  { %v1100_v60 = vpop.xlane.xlu0 %1099  ;;  %v1414_v12 = vadd.f32 %v2410_v15, %v1302_v61  ;;  %v1180_v38 = vmul.f32 %v1805_v33, %v2444_v32  ;;  %1814 = vrsqrt.f32 %v1159_v10 }
 0x280   :  { %v1136_v5 = vmul.f32 0.03125, %v1100_v60  ;;  %1427 = vst.msk [vmem:[%s2649_s5 + $0x40] sm:$0xff] %vm985_vm1, %v1411_v16  ;;  %v1297_v44 = vmul.f32 %v2368_v30, %v1185_v28  ;;  %1816 = vrsqrt.f32 %v1162_v26 }
 0x281   :  { %v1807_v59 = vpop.eup %1806  ;;  %1430 = vst.msk [vmem:[%s2649_s5 + $0x58] sm:$0xff] %vm985_vm1, %v1414_v12  ;;  %v1292_v8 = vmul.f32 %v2360_v29, %v1180_v38 }
 0x282   :  { %v1152_v15 = vadd.f32 1e-05, %v1136_v5  ;;  %v1809_v32 = vpop.eup %1808  ;;  %v1409_v21 = vadd.f32 %v2400_v4, %v1297_v44 }
 0x283   :  { %v1124_v13 = vpop.xlane.xlu0 %1123  ;;  %v1404_v23 = vadd.f32 %v2390_v57, %v1292_v8  ;;  %v1188_v19 = vmul.f32 %v1809_v32, %v2464_v18  ;;  %v1193_v57 = vmul.f32 %v1807_v59, %v2472_v3 }
 0x284   :  { %1818 = vrsqrt.f32 %v1152_v15  ;;  %v1144_v30 = vmul.f32 0.03125, %v1124_v13  ;;  %1425 = vst.msk [vmem:[%s2649_s5 + $0x30] sm:$0xff] %vm985_vm1, %v1409_v21 }
 0x285   :  { %v1811_v56 = vpop.eup %1810  ;;  %1420 = vst.msk [vmem:[%s2649_s5 + $0x8] sm:$0xff] %vm985_vm1, %v1404_v23  ;;  %v1300_v29 = vmul.f32 %v2374_v22, %v1188_v19  ;;  %v1305_v3 = vmul.f32 %v2384_v63, %v1193_v57 }
 0x286   :  { %v1160_v4 = vadd.f32 1e-05, %v1144_v30  ;;  %v1813_v17 = vpop.eup %1812  ;;  %v1183_v18 = vmul.f32 %v1811_v56, %v2486_v25 }
 0x287   :  { %v1412_v9 = vadd.f32 %v2406_v11, %v1300_v29  ;;  %v1186_v43 = vmul.f32 %v1813_v17, %v2477_v62 }
 0x288   :  { %1820 = vrsqrt.f32 %v1160_v4  ;;  %v1295_v52 = vmul.f32 %v2364_v34, %v1183_v18 }
 0x289   :  { %v1815_v14 = vpop.eup %1814  ;;  %1428 = vst.msk [vmem:[%s2649_s5 + $0x48] sm:$0xff] %vm985_vm1, %v1412_v9  ;;  %v1298_v22 = vmul.f32 %v2370_v40, %v1186_v43 }
 0x28a   :  { %v1817_v47 = vpop.eup %1816  ;;  %v1407_v25 = vadd.f32 %v2396_v0, %v1295_v52  ;;  %v1191_v11 = vmul.f32 %v1815_v14, %v2500_v20  ;;  %v1396_v48 = vpop.permute.xlu0 %1395 }
 0x28b   :  { %v1410_v62 = vadd.f32 %v2402_v6, %v1298_v22  ;;  %v1194_v34 = vmul.f32 %v1817_v47, %v2492_v2  ;;  %v1417_v46 = vadd.f32 %v1396_v48, %v1305_v3  ;;  %v1401_v6 = vpop.permute.xlu1 %1400 }
 0x28c   :  { %1423 = vst.msk [vmem:[%s2649_s5 + $0x20] sm:$0xff] %vm985_vm1, %v1407_v25  ;;  %v1303_v40 = vmul.f32 %v2380_v50, %v1191_v11 }
 0x28d   :  { %1426 = vst.msk [vmem:[%s2649_s5 + $0x38] sm:$0xff] %vm985_vm1, %v1410_v62  ;;  %v1306_v63 = vmul.f32 %v2386_v54, %v1194_v34  ;;  %1433 = vst.msk [vmem:[%s2649_s5 + $0x70] sm:$0xff] %vm985_vm1, %v1417_v46 }
 0x28e   :  { %v1819_v36 = vpop.eup %1818  ;;  %v1415_v0 = vadd.f32 %v2532_v39, %v1303_v40 }
 0x28f   :  { %v1184_v2 = vmul.f32 %v1819_v36, %v2505_v41  ;;  %v1418_v20 = vadd.f32 %v1401_v6, %v1306_v63 }
 0x290   :  { %1431 = vst.msk [vmem:[%s2649_s5 + $0x60] sm:$0xff] %vm985_vm1, %v1415_v0 }
 0x291   :  { %v1296_v50 = vmul.f32 %v2366_v37, %v1184_v2  ;;  %1434 = vst.msk [vmem:[%s2649_s5 + $0x78] sm:$0xff] %vm985_vm1, %v1418_v20 }
 0x292   :  { %v1821_v7 = vpop.eup %1820 }
 0x293   :  { %v1408_v54 = vadd.f32 %v2398_v1, %v1296_v50  ;;  %v1192_v39 = vmul.f32 %v1821_v7, %v2514_v58 }
 0x295   :  { %1424 = vst.msk [vmem:[%s2649_s5 + $0x28] sm:$0xff] %vm985_vm1, %v1408_v54  ;;  %v1304_v41 = vmul.f32 %v2382_v51, %v1192_v39 }
 0x297   :  { %v1416_v45 = vadd.f32 %v2530_v49, %v1304_v41 }
 0x299   :  { %1432 = vst.msk [vmem:[%s2649_s5 + $0x68] sm:$0xff] %vm985_vm1, %v1416_v45 }

</bundles_post_ra>
